<compile_context>
chip_gen: v6e
topology: v6e:2x2x1
jax: 0.10.0
libtpu: 0.0.40
codegen_flags: <defaults>
</compile_context>

<pallas_src>
import functools

import jax
import jax.numpy as jnp
import numpy as np
from jax.experimental import pallas as pl
from jax.experimental.pallas import tpu as pltpu


def _node_attention_hardmax_kernel(x_ref, s1_ref, b1_ref, theta_ref,
                                   s4_ref, b4_ref, gt_ref, s6_ref, b6_ref,
                                   o_ref, *, n_nodes, neg_slope):
    """One grid step = one (C, TM) slab of tokens of one batch element."""
    # bn_1 (per-channel affine), broadcast (C,1) along lanes
    phi = x_ref[0] * s1_ref[...] + b1_ref[...]                       # (C, TM)

    # tensor_product_1: f[n, m] = sum_c theta[n, c] * phi[c, m]
    f = jnp.dot(theta_ref[...], phi,
                preferred_element_type=jnp.float32)                  # (N, TM)

    # bn_4 (per-node affine)
    f = f * s4_ref[...] + b4_ref[...]

    # Softmax(dim=node) followed by Hardmax == one-hot(argmax over nodes):
    # softmax is strictly monotone per token, so compute the one-hot directly
    # (first-index tie-break, matching torch argmax/scatter semantics).
    m = jnp.max(f, axis=0, keepdims=True)                            # (1, TM)
    row = jax.lax.broadcasted_iota(jnp.int32, f.shape, 0).astype(jnp.float32)
    first = jnp.min(jnp.where(f == m, row, jnp.float32(n_nodes)),
                    axis=0, keepdims=True)                           # (1, TM)
    hard = (row == first).astype(jnp.float32)                        # (N, TM) one-hot

    # tensor_product_2: y[c, m] = sum_n g[n, c] * hard[n, m]
    y = jnp.dot(gt_ref[...], hard,
                preferred_element_type=jnp.float32)                  # (C, TM)

    # bn_6 + LeakyReLU(0.2)
    y = y * s6_ref[...] + b6_ref[...]
    o_ref[0] = jnp.where(y >= 0, y, neg_slope * y)


def node_attention_hardmax(x, params, *, tile_tokens=256, eps=1e-5):
    """x: (B, C, T, H, W) float32  ->  (B, C, T, H, W)."""
    B, C, T, H, W = x.shape
    nodes = params["nodes"]                                          # (N, C)
    N = nodes.shape[0]

    def fold(bn):
        gamma, beta, mean, var = bn
        s = gamma * jax.lax.rsqrt(var + eps)
        return s, beta - mean * s

    s1, o1 = fold(params["bn1"])     # per-channel (x)
    s2, o2 = fold(params["bn2"])     # per-channel (nodes)
    s3, o3 = fold(params["bn3"])     # per-node    (theta)
    s4, o4 = fold(params["bn4"])     # per-node    (f)
    s5, o5 = fold(params["bn5"])     # per-channel (nodes)
    s6, o6 = fold(params["bn6"])     # per-channel (y)

    # Parameter-only node path: bn_2 -> linear_1 -> bn_3, and g = bn_5(nodes).
    theta = nodes * s2[None, :] + o2[None, :]
    theta = jnp.dot(theta, params["w_lin"].T,
                    precision=jax.lax.Precision.HIGHEST) + params["b_lin"]
    theta = theta * s3[:, None] + o3[:, None]                        # (N, C)
    g_t = (nodes * s5[None, :] + o5[None, :]).T                      # (C, N)

    # Native layout, no transpose: (B, C, T, H, W) -> (B, C, THW), pad tokens.
    thw = T * H * W
    tm = int(tile_tokens)
    n_m = pl.cdiv(thw, tm)
    thw_p = n_m * tm
    x3 = x.reshape(B, C, thw)
    if thw_p != thw:
        x3 = jnp.pad(x3, ((0, 0), (0, 0), (0, thw_p - thw)))

    # Affine vectors as lane-broadcast columns.
    s1c, o1c = s1.reshape(C, 1), o1.reshape(C, 1)
    s4c, o4c = s4.reshape(N, 1), o4.reshape(N, 1)
    s6c, o6c = s6.reshape(C, 1), o6.reshape(C, 1)

    kernel = functools.partial(_node_attention_hardmax_kernel,
                               n_nodes=N, neg_slope=0.2)

    tok_spec = pl.BlockSpec((1, C, tm), lambda b, m: (b, 0, m))
    const2 = lambda b, m: (0, 0)

    flops = 4 * B * thw_p * C * N                         # two (N,C)x(C,TM)-class matmuls
    bytes_accessed = 4 * (2 * B * C * thw_p + 2 * N * C + 3 * 2 * (C + N))

    out = pl.pallas_call(
        kernel,
        out_shape=jax.ShapeDtypeStruct((B, C, thw_p), jnp.float32),
        grid=(B, n_m),
        in_specs=[
            tok_spec,                                  # x slab
            pl.BlockSpec((C, 1), const2), pl.BlockSpec((C, 1), const2),   # bn_1
            pl.BlockSpec((N, C), const2),                                  # theta
            pl.BlockSpec((N, 1), const2), pl.BlockSpec((N, 1), const2),   # bn_4
            pl.BlockSpec((C, N), const2),                                  # g^T
            pl.BlockSpec((C, 1), const2), pl.BlockSpec((C, 1), const2),   # bn_6
        ],
        out_specs=pl.BlockSpec((1, C, tm), lambda b, m: (b, 0, m)),
        compiler_params=pltpu.CompilerParams(
            dimension_semantics=("parallel", "parallel")),
        cost_estimate=pl.CostEstimate(flops=int(flops), transcendentals=0,
                                      bytes_accessed=int(bytes_accessed)),
    )(x3, s1c, o1c, theta, s4c, o4c, g_t, s6c, o6c)

    return out[:, :, :thw].reshape(B, C, T, H, W)


def reference_numpy(x, params, eps=1e-5):
    """Literal forward (softmax then hardmax) in numpy.  Also returns the
    per-token top-2 node-logit gap (hardmax is ill-conditioned near ties)."""
    x = np.asarray(x, np.float32)
    B, C, T, H, W = x.shape
    nodes = np.asarray(params["nodes"], np.float32)

    def fold(bn):
        g_, b_, m_, v_ = [np.asarray(a, np.float32) for a in bn]
        s = g_ / np.sqrt(v_ + eps)
        return s, b_ - m_ * s

    s1, o1 = fold(params["bn1"]); s2, o2 = fold(params["bn2"])
    s3, o3 = fold(params["bn3"]); s4, o4 = fold(params["bn4"])
    s5, o5 = fold(params["bn5"]); s6, o6 = fold(params["bn6"])
    w = np.asarray(params["w_lin"], np.float32)
    bl = np.asarray(params["b_lin"], np.float32)

    phi = x * s1[None, :, None, None, None] + o1[None, :, None, None, None]
    theta = nodes * s2[None, :] + o2[None, :]
    theta = theta @ w.T + bl
    theta = theta * s3[:, None] + o3[:, None]

    f = np.einsum("bcthw,nc->bhwnt", phi, theta)                     # (B,H,W,N,T)
    f = f * s4[None, None, None, :, None] + o4[None, None, None, :, None]

    e = np.exp(f - f.max(axis=3, keepdims=True))
    p = e / e.sum(axis=3, keepdims=True)                             # softmax over nodes
    idx = p.argmax(axis=3)
    hard = np.zeros_like(p)
    np.put_along_axis(hard, idx[:, :, :, None, :], 1.0, axis=3)      # hardmax

    g = nodes * s5[None, :] + o5[None, :]
    y = np.einsum("bhwnt,nc->bcthw", hard, g)
    y = y * s6[None, :, None, None, None] + o6[None, :, None, None, None]
    y = np.where(y >= 0, y, 0.2 * y)

    fs = np.sort(f, axis=3)
    gap = fs[..., -1, :] - fs[..., -2, :]                            # (B, H, W, T)
    return y, gap


def _bn_params(key, n):
    kg, kb, km, kv = jax.random.split(key, 4)
    return (1.0 + 0.1 * jax.random.normal(kg, (n,), jnp.float32),
            0.1 * jax.random.normal(kb, (n,), jnp.float32),
            0.1 * jax.random.normal(km, (n,), jnp.float32),
            jax.random.uniform(kv, (n,), jnp.float32, minval=0.5, maxval=1.5))


def init_params(key, C, N):
    ks = jax.random.split(key, 9)
    return {
        "nodes": jax.random.normal(ks[0], (N, C), jnp.float32),
        "w_lin": (1.0 / jnp.sqrt(C)) * jax.random.normal(ks[1], (C, C), jnp.float32),
        "b_lin": 0.1 * jax.random.normal(ks[2], (C,), jnp.float32),
        "bn1": _bn_params(ks[3], C),
        "bn2": _bn_params(ks[4], C),
        "bn3": _bn_params(ks[5], N),
        "bn4": _bn_params(ks[6], N),
        "bn5": _bn_params(ks[7], C),
        "bn6": _bn_params(ks[8], C),
    }


if __name__ == "__main__":
    B, C, T, H, W = 2, 128, 4, 8, 8
    N = 128   # n_nodes

    key = jax.random.PRNGKey(0)
    kx, kp = jax.random.split(key)
    x = jax.random.normal(kx, (B, C, T, H, W), jnp.float32)
    params = init_params(kp, C, N)

    y = node_attention_hardmax(x, params)
    y = jax.block_until_ready(y)
    assert y.shape == (B, C, T, H, W), y.shape

    y_ref, gap = reference_numpy(x, params)
    # Only compare tokens whose top-2 node logits are well separated: the
    # hardmax is discontinuous at ties, so those tokens are ill-conditioned.
    well = gap > 5e-2                                                # (B, H, W, T)
    assert well.mean() > 0.9, float(well.mean())
    mask = np.broadcast_to(np.transpose(well, (0, 3, 1, 2))[:, None], y_ref.shape)
    diff = np.abs(np.asarray(y) - y_ref)
    tol = 5e-3 + 5e-3 * np.abs(y_ref)
    assert np.all(diff[mask] <= tol[mask]), float(np.max(diff[mask] - tol[mask]))

    print("KERNEL_OK")
</pallas_src>

<mosaic_0001>
module attributes {stable_mosaic.version = 11 : i64} {
  func.func @_node_attention_hardmax_kernel(%arg0: i32, %arg1: i32, %arg2: memref<1x128x256xf32, #tpu.memory_space<vmem>>, %arg3: memref<128x1xf32, #tpu.memory_space<vmem>>, %arg4: memref<128x1xf32, #tpu.memory_space<vmem>>, %arg5: memref<128x128xf32, #tpu.memory_space<vmem>>, %arg6: memref<128x1xf32, #tpu.memory_space<vmem>>, %arg7: memref<128x1xf32, #tpu.memory_space<vmem>>, %arg8: memref<128x128xf32, #tpu.memory_space<vmem>>, %arg9: memref<128x1xf32, #tpu.memory_space<vmem>>, %arg10: memref<128x1xf32, #tpu.memory_space<vmem>>, %arg11: memref<1x128x256xf32, #tpu.memory_space<vmem>>) attributes {dimension_semantics = [#tpu.dimension_semantics<parallel>, #tpu.dimension_semantics<parallel>], iteration_bounds = array<i64: 2, 1>, scalar_prefetch = 0 : i64, scratch_operands = 0 : i64, tpu.core_type = #tpu.core_type<tc>, window_params = [{transform_indices = @transform_0, window_bounds = array<i64: 1, 128, 256>}, {pipeline_mode = #tpu.pipeline_mode<synchronous>, transform_indices = @transform_1, window_bounds = array<i64: 128, 1>}, {pipeline_mode = #tpu.pipeline_mode<synchronous>, transform_indices = @transform_2, window_bounds = array<i64: 128, 1>}, {pipeline_mode = #tpu.pipeline_mode<synchronous>, transform_indices = @transform_3, window_bounds = array<i64: 128, 128>}, {pipeline_mode = #tpu.pipeline_mode<synchronous>, transform_indices = @transform_4, window_bounds = array<i64: 128, 1>}, {pipeline_mode = #tpu.pipeline_mode<synchronous>, transform_indices = @transform_5, window_bounds = array<i64: 128, 1>}, {pipeline_mode = #tpu.pipeline_mode<synchronous>, transform_indices = @transform_6, window_bounds = array<i64: 128, 128>}, {pipeline_mode = #tpu.pipeline_mode<synchronous>, transform_indices = @transform_7, window_bounds = array<i64: 128, 1>}, {pipeline_mode = #tpu.pipeline_mode<synchronous>, transform_indices = @transform_8, window_bounds = array<i64: 128, 1>}, {transform_indices = @transform_9, window_bounds = array<i64: 1, 128, 256>}]} {
    %c0 = arith.constant 0 : index
    %c0_0 = arith.constant 0 : index
    %c0_1 = arith.constant 0 : index
    %0 = vector.load %arg2[%c0, %c0_0, %c0_1] : memref<1x128x256xf32, #tpu.memory_space<vmem>>, vector<1x128x256xf32>
    %1 = vector.shape_cast %0 : vector<1x128x256xf32> to vector<128x256xf32>
    %c0_2 = arith.constant 0 : index
    %c0_3 = arith.constant 0 : index
    %2 = vector.load %arg3[%c0_2, %c0_3] : memref<128x1xf32, #tpu.memory_space<vmem>>, vector<128x1xf32>
    %3 = vector.broadcast %2 : vector<128x1xf32> to vector<128x256xf32>
    %4 = arith.mulf %1, %3 : vector<128x256xf32>
    %c0_4 = arith.constant 0 : index
    %c0_5 = arith.constant 0 : index
    %5 = vector.load %arg4[%c0_4, %c0_5] : memref<128x1xf32, #tpu.memory_space<vmem>>, vector<128x1xf32>
    %6 = vector.broadcast %5 : vector<128x1xf32> to vector<128x256xf32>
    %7 = arith.addf %4, %6 : vector<128x256xf32>
    %c0_6 = arith.constant 0 : index
    %c0_7 = arith.constant 0 : index
    %8 = vector.load %arg5[%c0_6, %c0_7] : memref<128x128xf32, #tpu.memory_space<vmem>>, vector<128x128xf32>
    %cst = arith.constant dense<0.000000e+00> : vector<128x256xf32>
    %9 = tpu.matmul %8, %7, %cst {dimension_numbers = #tpu.dot_dimension_numbers<[1], [0], [0], [1], [0, 0, 1, 1], [], []>} : vector<128x128xf32>, vector<128x256xf32>, vector<128x256xf32> -> vector<128x256xf32>
    %c0_8 = arith.constant 0 : index
    %c0_9 = arith.constant 0 : index
    %10 = vector.load %arg6[%c0_8, %c0_9] : memref<128x1xf32, #tpu.memory_space<vmem>>, vector<128x1xf32>
    %11 = vector.broadcast %10 : vector<128x1xf32> to vector<128x256xf32>
    %12 = arith.mulf %9, %11 : vector<128x256xf32>
    %c0_10 = arith.constant 0 : index
    %c0_11 = arith.constant 0 : index
    %13 = vector.load %arg7[%c0_10, %c0_11] : memref<128x1xf32, #tpu.memory_space<vmem>>, vector<128x1xf32>
    %14 = vector.broadcast %13 : vector<128x1xf32> to vector<128x256xf32>
    %15 = arith.addf %12, %14 : vector<128x256xf32>
    %cst_12 = arith.constant dense<0xFF800000> : vector<256xf32>
    %16 = vector.multi_reduction <maximumf>, %15, %cst_12 [0] : vector<128x256xf32> to vector<256xf32>
    %17 = vector.shape_cast %16 : vector<256xf32> to vector<1x256xf32>
    %18 = tpu.iota {dimensions = array<i32: 0>} : vector<128x256xi32>
    %19 = arith.sitofp %18 : vector<128x256xi32> to vector<128x256xf32>
    %20 = vector.broadcast %17 : vector<1x256xf32> to vector<128x256xf32>
    %21 = arith.cmpf oeq, %15, %20 : vector<128x256xf32>
    %cst_13 = arith.constant 1.280000e+02 : f32
    %22 = vector.broadcast %cst_13 : f32 to vector<128x256xf32>
    %23 = arith.select %21, %19, %22 : vector<128x256xi1>, vector<128x256xf32>
    %cst_14 = arith.constant dense<0x7F800000> : vector<256xf32>
    %24 = vector.multi_reduction <minimumf>, %23, %cst_14 [0] : vector<128x256xf32> to vector<256xf32>
    %25 = vector.shape_cast %24 : vector<256xf32> to vector<1x256xf32>
    %26 = vector.broadcast %25 : vector<1x256xf32> to vector<128x256xf32>
    %27 = arith.cmpf oeq, %19, %26 : vector<128x256xf32>
    %28 = arith.extui %27 : vector<128x256xi1> to vector<128x256xi32>
    %29 = arith.sitofp %28 : vector<128x256xi32> to vector<128x256xf32>
    %c0_15 = arith.constant 0 : index
    %c0_16 = arith.constant 0 : index
    %30 = vector.load %arg8[%c0_15, %c0_16] : memref<128x128xf32, #tpu.memory_space<vmem>>, vector<128x128xf32>
    %cst_17 = arith.constant dense<0.000000e+00> : vector<128x256xf32>
    %31 = tpu.matmul %30, %29, %cst_17 {dimension_numbers = #tpu.dot_dimension_numbers<[1], [0], [0], [1], [0, 0, 1, 1], [], []>} : vector<128x128xf32>, vector<128x256xf32>, vector<128x256xf32> -> vector<128x256xf32>
    %c0_18 = arith.constant 0 : index
    %c0_19 = arith.constant 0 : index
    %32 = vector.load %arg9[%c0_18, %c0_19] : memref<128x1xf32, #tpu.memory_space<vmem>>, vector<128x1xf32>
    %33 = vector.broadcast %32 : vector<128x1xf32> to vector<128x256xf32>
    %34 = arith.mulf %31, %33 : vector<128x256xf32>
    %c0_20 = arith.constant 0 : index
    %c0_21 = arith.constant 0 : index
    %35 = vector.load %arg10[%c0_20, %c0_21] : memref<128x1xf32, #tpu.memory_space<vmem>>, vector<128x1xf32>
    %36 = vector.broadcast %35 : vector<128x1xf32> to vector<128x256xf32>
    %37 = arith.addf %34, %36 : vector<128x256xf32>
    %cst_22 = arith.constant 0.000000e+00 : f32
    %38 = vector.broadcast %cst_22 : f32 to vector<128x256xf32>
    %39 = arith.cmpf oge, %37, %38 : vector<128x256xf32>
    %cst_23 = arith.constant 2.000000e-01 : f32
    %40 = vector.broadcast %cst_23 : f32 to vector<128x256xf32>
    %41 = arith.mulf %40, %37 : vector<128x256xf32>
    %42 = arith.select %39, %37, %41 : vector<128x256xi1>, vector<128x256xf32>
    %c0_24 = arith.constant 0 : index
    %c0_25 = arith.constant 0 : index
    %c0_26 = arith.constant 0 : index
    %43 = vector.load %arg11[%c0_24, %c0_25, %c0_26] : memref<1x128x256xf32, #tpu.memory_space<vmem>>, vector<1x128x256xf32>
    %44 = vector.shape_cast %43 : vector<1x128x256xf32> to vector<128x256xf32>
    %45 = vector.shape_cast %42 : vector<128x256xf32> to vector<1x128x256xf32>
    tpu.vector_store %arg11[%c0_24, %c0_25, %c0_26], %45 {strides = array<i32>} : memref<1x128x256xf32, #tpu.memory_space<vmem>>, vector<1x128x256xf32>,
    return
  }
  func.func @transform_0(%arg0: i32, %arg1: i32) -> (i32, i32, i32) {
    %c0_i32 = arith.constant 0 : i32
    %c0_i32_0 = arith.constant 0 : i32
    return %arg0, %c0_i32, %arg1 : i32, i32, i32
  }
  func.func @transform_1(%arg0: i32, %arg1: i32) -> (i32, i32) {
    %c0_i32 = arith.constant 0 : i32
    %c0_i32_0 = arith.constant 0 : i32
    %c0_i32_1 = arith.constant 0 : i32
    return %c0_i32, %c0_i32_0 : i32, i32
  }
  func.func @transform_2(%arg0: i32, %arg1: i32) -> (i32, i32) {
    %c0_i32 = arith.constant 0 : i32
    %c0_i32_0 = arith.constant 0 : i32
    %c0_i32_1 = arith.constant 0 : i32
    return %c0_i32, %c0_i32_0 : i32, i32
  }
  func.func @transform_3(%arg0: i32, %arg1: i32) -> (i32, i32) {
    %c0_i32 = arith.constant 0 : i32
    %c0_i32_0 = arith.constant 0 : i32
    %c0_i32_1 = arith.constant 0 : i32
    return %c0_i32, %c0_i32_0 : i32, i32
  }
  func.func @transform_4(%arg0: i32, %arg1: i32) -> (i32, i32) {
    %c0_i32 = arith.constant 0 : i32
    %c0_i32_0 = arith.constant 0 : i32
    %c0_i32_1 = arith.constant 0 : i32
    return %c0_i32, %c0_i32_0 : i32, i32
  }
  func.func @transform_5(%arg0: i32, %arg1: i32) -> (i32, i32) {
    %c0_i32 = arith.constant 0 : i32
    %c0_i32_0 = arith.constant 0 : i32
    %c0_i32_1 = arith.constant 0 : i32
    return %c0_i32, %c0_i32_0 : i32, i32
  }
  func.func @transform_6(%arg0: i32, %arg1: i32) -> (i32, i32) {
    %c0_i32 = arith.constant 0 : i32
    %c0_i32_0 = arith.constant 0 : i32
    %c0_i32_1 = arith.constant 0 : i32
    return %c0_i32, %c0_i32_0 : i32, i32
  }
  func.func @transform_7(%arg0: i32, %arg1: i32) -> (i32, i32) {
    %c0_i32 = arith.constant 0 : i32
    %c0_i32_0 = arith.constant 0 : i32
    %c0_i32_1 = arith.constant 0 : i32
    return %c0_i32, %c0_i32_0 : i32, i32
  }
  func.func @transform_8(%arg0: i32, %arg1: i32) -> (i32, i32) {
    %c0_i32 = arith.constant 0 : i32
    %c0_i32_0 = arith.constant 0 : i32
    %c0_i32_1 = arith.constant 0 : i32
    return %c0_i32, %c0_i32_0 : i32, i32
  }
  func.func @transform_9(%arg0: i32, %arg1: i32) -> (i32, i32, i32) {
    %c0_i32 = arith.constant 0 : i32
    %c0_i32_0 = arith.constant 0 : i32
    return %arg0, %c0_i32, %arg1 : i32, i32, i32
  }
}

</mosaic_0001>

<bundles_post_ra>
// kernel: tpu_custom_call.1
= control target key start
LH: loop header
LB: loop body
LE: loop exit
PB: predicated region body
PF: predicated region fallthrough
CT: control target
= control target key end

     0   :  { %s3351_s0 = inlined_call_operand.vmem [shape: f32[2,128,256], index: 0, kind: input, shape index: {}]   ;;  %s3352_s1 = inlined_call_operand.vmem [shape: f32[128,1], index: 1, kind: input, shape index: {}]   ;;  %s3353_s2 = inlined_call_operand.vmem [shape: f32[128,1], index: 2, kind: input, shape index: {}]   ;;  %s3354_s3 = inlined_call_operand.vmem [shape: f32[128,128], index: 3, kind: input, shape index: {}]   ;;  %s3355_s4 = inlined_call_operand.vmem [shape: f32[128,1], index: 4, kind: input, shape index: {}]   ;;  %s3356_s5 = inlined_call_operand.vmem [shape: f32[128,1], index: 5, kind: input, shape index: {}]   ;;  %s3357_s6 = inlined_call_operand.vmem [shape: f32[128,128], index: 6, kind: input, shape index: {}]   ;;  %s3358_s7 = inlined_call_operand.vmem [shape: f32[128,1], index: 7, kind: input, shape index: {}]   ;;  %s3359_s8 = inlined_call_operand.vmem [shape: f32[128,1], index: 8, kind: input, shape index: {}]   ;;  %s3360_s9 = inlined_call_operand.hbm [shape: f32[2,128,256], index: 9, kind: output, shape index: {}]  }
   0x1   :  { %3361 = sst [smem:[#allocation5_spill]] %s3352_s1 }
   0x2   :  { %14 = vsyncpa [#allocation3], 0 }
   0x3   :  { %16 = vsyncpa [#allocation3 + $0x1], 0  ;;  %s2291_s30 = smov 0   ;;  %s2293_s10 = smov 0  }
   0x4   :  { %s2295_s11 = smov 0   ;;  %s2297_s12 = smov 0  }
   0x5   :  { %s2299_s13 = smov 0   ;;  %s2301_s14 = smov 0  }
   0x6 LB: > { %s2016_s15 = sadd.s32 4294967295, %s2233_s14   ;;  %s2017_s16 = sadd.s32 4294967294, %s2233_s14   ;;  %s2233_s14 = sphi %s2301_s14, %s22_s14   ;;  %s2229_s13 = sphi %s2299_s13, %s3369_s13   ;;  %s2225_s12 = sphi %s2297_s12, %s3368_s12   ;;  %s2221_s11 = sphi %s2295_s11, %s3367_s11   ;;  %s2217_s10 = sphi %s2293_s10, %s3366_s10   ;;  %s2213_s30 = sphi %s2291_s30, %s3365_s30  }
   0x7   : > { %s34_s17 = sadd.s32 1, %s2229_s13  ;;  %s239_s18 = sadd.s32 1, %s2221_s11 }
   0x8   : > { %p36_p0 = scmp.ge.s32.totalorder %s34_s17, 2  ;;  %p249_p1 = scmp.ne.s32.totalorder %s2221_s11, %s2217_s10 }
   0x9   : > { %p250_p2 = scmp.eq.s32.totalorder %s2016_s15, 1  ;;  %p255_p3 = scmp.ne.s32.totalorder %s2217_s10, %s2213_s30 }
   0xa   : > { %s3371_s17 = smov (%p36_p0, %s34_s17), 0  ;;  %p256_p5 = scmp.eq.s32.totalorder %s2017_s16, 1 }
   0xb   : > { %p2331_p4 = por %p250_p2, %p249_p1  ;;  %s234_s20 = ssub.s32 %s2229_s13, %s3371_s17 }
   0xc   : > { %p2020_p6 = scmp.ge.s32.totalorder %s2233_s14, 1  ;;  %p237_p7 = scmp.eq.s32.totalorder %s234_s20, 0 }
   0xd   : > { %p2338_p8 = por %p256_p5, %p255_p3  ;;  %p311_p9 = scmp.lt.s32.totalorder %s2233_s14, 3 }
   0xe   : > { %s2344_s22 = scalar_select %p237_p7, %s2221_s11, %s239_s18  }
   0xf   : > { %p312_p10 = pnand %p2020_p6, %p311_p9 }
  0x10   : > { %s3364_s1 = sld [smem:[#allocation5_spill]] (!%p312_p10)  ;;  %p352_p11 = scmp.lt.s32.totalorder (!%p312_p10), %s2225_s12, 1 }
  0x11   : > { %315 = sbr.rel (%p312_p10) target bundleno = 840 (0x348), region = 56  ;;  %s2094_s26 = sshll.u32 (!%p312_p10), %s2225_s12, 12 }
  0x12   : > { %s2238_s18 = smov (!%p312_p10), [#allocation2]  }
  0x13   : > { %s2161_s20 = sshll.u32 (!%p312_p10), %s2238_s18, 4  ;;  %s2162_s20 = int_to_ptr.vmem [resolvable:$false] %s2161_s20 }
  0x16   : > { %v537_v0 = vld [vmem:[%s3353_s2 + $0x78] sm:$0xff]  ;;  %v2235_v2 = vmov 0   ;;  %v408_v3 = vld [vmem:[%s3364_s1 + $0x70] sm:$0xff]  ;;  %v407_v4 = vld [vmem:[%s3364_s1 + $0x68] sm:$0xff]  ;;  %v2236_v35 = vmov 0.0   ;;  %s353_s29 = scalar_select %p352_p11, %s2225_s12, 1 }
  0x17   : > { %v409_v1 = vld [vmem:[%s3364_s1 + $0x78] sm:$0xff]  ;;  %2156 = vset.pattern.permute.xlu1 %v2235_v2  ;;  %2155 = vset.pattern.permute.xlu0 %v2235_v2  ;;  %v536_v5 = vld [vmem:[%s3353_s2 + $0x70] sm:$0xff]  ;;  %v406_v6 = vld [vmem:[%s3364_s1 + $0x60] sm:$0xff] }
  0x18   : > { %615 = vperm.xlu1 %2156, %v537_v0   ;;  %487 = vperm.xlu0 %2155, %v409_v1   ;;  %v535_v7 = vld [vmem:[%s3353_s2 + $0x68] sm:$0xff]  ;;  %v405_v8 = vld [vmem:[%s3364_s1 + $0x58] sm:$0xff]  ;;  %v534_v9 = vld [vmem:[%s3353_s2 + $0x60] sm:$0xff]  ;;  %s2093_s23 = sshll.u32 %s353_s29, 8  ;;  %s3299_s29 = scalar_lea.hbm %s3360_s9, %s2094_s26 }
  0x19   : > { %v404_v10 = vld [vmem:[%s3364_s1 + $0x50] sm:$0xff]  ;;  %v533_v11 = vld [vmem:[%s3353_s2 + $0x58] sm:$0xff]  ;;  %v403_v12 = vld [vmem:[%s3364_s1 + $0x48] sm:$0xff]  ;;  %730 = vmatprep.mubr.f32.mxu0 %v2236_v35  ;;  %1440 = vmatprep.mubr.f32.mxu1 %v2236_v35  ;;  %s2539_s15 = scalar_lea.vmem %s3351_s0, %s2093_s23  ;;  %s348_s23 = sand.u32 1, %s2217_s10  }
  0x1a   : > { %v532_v13 = vld [vmem:[%s3353_s2 + $0x50] sm:$0xff]  ;;  %v402_v14 = vld [vmem:[%s3364_s1 + $0x40] sm:$0xff]  ;;  %v531_v15 = vld [vmem:[%s3353_s2 + $0x48] sm:$0xff]  ;;  %s2021_s24 = sshll.u32 %s348_s23, 8  ;;  %s3306_s12 = scalar_lea.sflag [#allocation3], %s348_s23 }
  0x1b   : > { %v401_v16 = vld [vmem:[%s3364_s1 + $0x38] sm:$0xff]  ;;  %v530_v17 = vld [vmem:[%s3353_s2 + $0x40] sm:$0xff]  ;;  %v400_v18 = vld [vmem:[%s3364_s1 + $0x30] sm:$0xff]  ;;  %s3235_s25 = scalar_lea.vmem [#allocation2], %s2021_s24 }
  0x1c   : > { %482 = vperm.xlu0 %2155, %v408_v3   ;;  %477 = vperm.xlu1 %2156, %v407_v4   ;;  %v529_v19 = vld [vmem:[%s3353_s2 + $0x38] sm:$0xff]  ;;  %v399_v20 = vld [vmem:[%s3364_s1 + $0x28] sm:$0xff]  ;;  %v528_v21 = vld [vmem:[%s3353_s2 + $0x30] sm:$0xff]  ;;  %s1937_s27 = sshll.u32 %s3235_s25, 4  ;;  %s3301_s27 = int_to_ptr.vmem [resolvable:$true] %s1937_s27 }
  0x1d   : > { %v398_v22 = vld [vmem:[%s3364_s1 + $0x20] sm:$0xff]  ;;  %v527_v23 = vld [vmem:[%s3353_s2 + $0x28] sm:$0xff]  ;;  %v397_v24 = vld [vmem:[%s3364_s1 + $0x18] sm:$0xff]  ;;  %s2157_s16 = scalar_lea.vmem %s3301_s27, 4096  ;;  %p2164_p1 = scmp.lt.s32.totalorder %s3301_s27, %s2162_s20 }
  0x1e   : > { %v526_v25 = vld [vmem:[%s3353_s2 + $0x20] sm:$0xff]  ;;  %v396_v26 = vld [vmem:[%s3364_s1 + $0x10] sm:$0xff]  ;;  %v525_v27 = vld [vmem:[%s3353_s2 + $0x18] sm:$0xff]  ;;  %p2158_p12 = scmp.ne.s32.totalorder %s3301_s27, %s2157_s16 }
  0x1f   : > { %v395_v28 = vld [vmem:[%s3364_s1 + $0x8] sm:$0xff]  ;;  %v524_v29 = vld [vmem:[%s3353_s2 + $0x10] sm:$0xff]  ;;  %v394_v30 = vld [vmem:[%s3364_s1] sm:$0xff]  ;;  %s2163_s1 = scalar_lea.vmem %s2162_s20, 8192 }
  0x20   : > { %610 = vperm.xlu0 %2155, %v536_v5   ;;  %472 = vperm.xlu1 %2156, %v406_v6   ;;  %v523_v31 = vld [vmem:[%s3353_s2 + $0x8] sm:$0xff]  ;;  %v522_v32 = vld [vmem:[%s3353_s2] sm:$0xff]  ;;  %v829_v36 = vld [vmem:[%s3355_s4 + $0x10] sm:$0xff]  ;;  %p2159_p13 = pnand %p2158_p12, %p2331_p4  ;;  %p2165_p2 = scmp.lt.s32.totalorder %s2163_s1, %s2157_s16 }
  0x21   : > { %v827_v33 = vld [vmem:[%s3355_s4] sm:$0xff]  ;;  %v828_v34 = vld [vmem:[%s3355_s4 + $0x8] sm:$0xff]  ;;  %v830_v37 = vld [vmem:[%s3355_s4 + $0x18] sm:$0xff] }
  0x22   : > { %v831_v38 = vld [vmem:[%s3355_s4 + $0x20] sm:$0xff]  ;;  %v832_v39 = vld [vmem:[%s3355_s4 + $0x28] sm:$0xff]  ;;  %v957_v42 = vld [vmem:[%s3356_s5 + $0x10] sm:$0xff]  ;;  %p2160_p0 = pneg %p2159_p13  ;;  %p2166_p3 = por %p2165_p2, %p2164_p1 }
  0x23   : > { %v955_v40 = vld [vmem:[%s3356_s5] sm:$0xff]  ;;  %v956_v41 = vld [vmem:[%s3356_s5 + $0x8] sm:$0xff]  ;;  %v958_v43 = vld [vmem:[%s3356_s5 + $0x18] sm:$0xff] }
  0x24   : > { %605 = vperm.xlu0 %2155, %v535_v7   ;;  %467 = vperm.xlu1 %2156, %v405_v8   ;;  %v833_v44 = vld [vmem:[%s3355_s4 + $0x30] sm:$0xff]  ;;  %v834_v45 = vld [vmem:[%s3355_s4 + $0x38] sm:$0xff]  ;;  %v959_v46 = vld [vmem:[%s3356_s5 + $0x20] sm:$0xff]  ;;  %p2167_p5 = pnand %p2166_p3, %p2160_p0 }
  0x25   : > { %v960_v47 = vld [vmem:[%s3356_s5 + $0x28] sm:$0xff]  ;;  %v835_v48 = vld [vmem:[%s3355_s4 + $0x40] sm:$0xff]  ;;  %v961_v50 = vld [vmem:[%s3356_s5 + $0x30] sm:$0xff] }
  0x26   : > { %v836_v49 = vld [vmem:[%s3355_s4 + $0x48] sm:$0xff]  ;;  %v962_v51 = vld [vmem:[%s3356_s5 + $0x38] sm:$0xff]  ;;  %v837_v52 = vld [vmem:[%s3355_s4 + $0x50] sm:$0xff] }
  0x27   : > { %v838_v53 = vld [vmem:[%s3355_s4 + $0x58] sm:$0xff]  ;;  %v963_v54 = vld [vmem:[%s3356_s5 + $0x40] sm:$0xff]  ;;  %v964_v55 = vld [vmem:[%s3356_s5 + $0x48] sm:$0xff] }
  0x28   : > { %600 = vperm.xlu0 %2155, %v534_v9   ;;  %462 = vperm.xlu1 %2156, %v404_v10   ;;  %v839_v56 = vld [vmem:[%s3355_s4 + $0x60] sm:$0xff]  ;;  %v840_v57 = vld [vmem:[%s3355_s4 + $0x68] sm:$0xff]  ;;  %v965_v58 = vld [vmem:[%s3356_s5 + $0x50] sm:$0xff] }
  0x29   : > { %v966_v59 = vld [vmem:[%s3356_s5 + $0x58] sm:$0xff]  ;;  %v841_v60 = vld [vmem:[%s3355_s4 + $0x70] sm:$0xff]  ;;  %v967_v62 = vld [vmem:[%s3356_s5 + $0x60] sm:$0xff] }
  0x2a   : > { %v842_v61 = vld [vmem:[%s3355_s4 + $0x78] sm:$0xff]  ;;  %v968_v63 = vld [vmem:[%s3356_s5 + $0x68] sm:$0xff]  ;;  %v392_v0 = vld [vmem:[%s2539_s15 + $0xf0] sm:$0xff] }
  0x2b   : > { %v393_v1 = vld [vmem:[%s2539_s15 + $0xf8] sm:$0xff]  ;;  %v969_v2 = vld [vmem:[%s3356_s5 + $0x70] sm:$0xff]  ;;  %v1537_v8 = vld [vmem:[%s3358_s7] sm:$0xff] }
  0x2c   : > { %595 = vperm.xlu0 %2155, %v533_v11   ;;  %457 = vperm.xlu1 %2156, %v403_v12   ;;  %v970_v3 = vld [vmem:[%s3356_s5 + $0x78] sm:$0xff]  ;;  %v1538_v9 = vld [vmem:[%s3358_s7 + $0x8] sm:$0xff] }
  0x30   : > { %590 = vperm.xlu0 %2155, %v532_v13   ;;  %452 = vperm.xlu1 %2156, %v402_v14   ;;  %v390_v13 = vld [vmem:[%s2539_s15 + $0xe0] sm:$0xff]  ;;  %v391_v14 = vld [vmem:[%s2539_s15 + $0xe8] sm:$0xff] }
  0x34   : > { %585 = vperm.xlu0 %2155, %v531_v15   ;;  %447 = vperm.xlu1 %2156, %v401_v16   ;;  %v1539_v16 = vld [vmem:[%s3358_s7 + $0x10] sm:$0xff] }
  0x38   : > { %580 = vperm.xlu0 %2155, %v530_v17   ;;  %442 = vperm.xlu1 %2156, %v400_v18  }
  0x3c   : > { %575 = vperm.xlu0 %2155, %v529_v19   ;;  %437 = vperm.xlu1 %2156, %v399_v20   ;;  %v1540_v19 = vld [vmem:[%s3358_s7 + $0x18] sm:$0xff]  ;;  %v388_v20 = vld [vmem:[%s2539_s15 + $0xd0] sm:$0xff] }
  0x40   : > { %570 = vperm.xlu0 %2155, %v528_v21   ;;  %432 = vperm.xlu1 %2156, %v398_v22   ;;  %v389_v21 = vld [vmem:[%s2539_s15 + $0xd8] sm:$0xff] }
  0x44   : > { %565 = vperm.xlu0 %2155, %v527_v23   ;;  %427 = vperm.xlu1 %2156, %v397_v24  }
  0x48   : > { %560 = vperm.xlu0 %2155, %v526_v25   ;;  %422 = vperm.xlu1 %2156, %v396_v26   ;;  %v1541_v26 = vld [vmem:[%s3358_s7 + $0x20] sm:$0xff] }
  0x4c   : > { %555 = vperm.xlu0 %2155, %v525_v27   ;;  %417 = vperm.xlu1 %2156, %v395_v28  }
  0x50   : > { %550 = vperm.xlu0 %2155, %v524_v29   ;;  %412 = vperm.xlu1 %2156, %v394_v30   ;;  %v1542_v29 = vld [vmem:[%s3358_s7 + $0x28] sm:$0xff]  ;;  %v386_v30 = vld [vmem:[%s2539_s15 + $0xc0] sm:$0xff] }
  0x54   : > { %545 = vperm.xlu0 %2155, %v523_v31   ;;  %540 = vperm.xlu1 %2156, %v522_v32   ;;  %v387_v31 = vld [vmem:[%s2539_s15 + $0xc8] sm:$0xff] }
  0x58   : > { %845 = vperm.xlu0 %2155, %v827_v33   ;;  %850 = vperm.xlu1 %2156, %v828_v34  }
  0x5c   : > { %855 = vperm.xlu0 %2155, %v829_v36   ;;  %860 = vperm.xlu1 %2156, %v830_v37   ;;  %v1543_v37 = vld [vmem:[%s3358_s7 + $0x30] sm:$0xff] }
  0x60   : > { %865 = vperm.xlu0 %2155, %v831_v38   ;;  %870 = vperm.xlu1 %2156, %v832_v39  }
  0x64   : > { %973 = vperm.xlu0 %2155, %v955_v40   ;;  %978 = vperm.xlu1 %2156, %v956_v41   ;;  %v1544_v40 = vld [vmem:[%s3358_s7 + $0x38] sm:$0xff]  ;;  %v384_v41 = vld [vmem:[%s2539_s15 + $0xb0] sm:$0xff] }
  0x68   : > { %983 = vperm.xlu0 %2155, %v957_v42   ;;  %988 = vperm.xlu1 %2156, %v958_v43   ;;  %v385_v42 = vld [vmem:[%s2539_s15 + $0xb8] sm:$0xff] }
  0x6c   : > { %875 = vperm.xlu0 %2155, %v833_v44   ;;  %880 = vperm.xlu1 %2156, %v834_v45  }
  0x70   : > { %993 = vperm.xlu0 %2155, %v959_v46   ;;  %998 = vperm.xlu1 %2156, %v960_v47   ;;  %v1545_v47 = vld [vmem:[%s3358_s7 + $0x40] sm:$0xff] }
  0x74   : > { %885 = vperm.xlu0 %2155, %v835_v48   ;;  %890 = vperm.xlu1 %2156, %v836_v49  }
  0x78   : > { %1003 = vperm.xlu0 %2155, %v961_v50   ;;  %1008 = vperm.xlu1 %2156, %v962_v51   ;;  %v1546_v50 = vld [vmem:[%s3358_s7 + $0x48] sm:$0xff]  ;;  %v382_v51 = vld [vmem:[%s2539_s15 + $0xa0] sm:$0xff] }
  0x7c   : > { %895 = vperm.xlu0 %2155, %v837_v52   ;;  %900 = vperm.xlu1 %2156, %v838_v53   ;;  %v383_v52 = vld [vmem:[%s2539_s15 + $0xa8] sm:$0xff] }
  0x80   : > { %1013 = vperm.xlu0 %2155, %v963_v54   ;;  %1018 = vperm.xlu1 %2156, %v964_v55  }
  0x84   : > { %905 = vperm.xlu0 %2155, %v839_v56   ;;  %910 = vperm.xlu1 %2156, %v840_v57   ;;  %v1547_v57 = vld [vmem:[%s3358_s7 + $0x50] sm:$0xff] }
  0x88   : > { %1023 = vperm.xlu0 %2155, %v965_v58   ;;  %1028 = vperm.xlu1 %2156, %v966_v59  }
  0x8c   : > { %915 = vperm.xlu0 %2155, %v841_v60   ;;  %920 = vperm.xlu1 %2156, %v842_v61   ;;  %v1548_v60 = vld [vmem:[%s3358_s7 + $0x58] sm:$0xff]  ;;  %v380_v61 = vld [vmem:[%s2539_s15 + $0x90] sm:$0xff] }
  0x90   : > { %1033 = vperm.xlu0 %2155, %v967_v62   ;;  %1038 = vperm.xlu1 %2156, %v968_v63   ;;  %v381_v62 = vld [vmem:[%s2539_s15 + $0x98] sm:$0xff] }
  0x93   : > { %v616_v4 = vpop.permute.xlu1 %615  ;;  %v488_v5 = vpop.permute.xlu0 %487 }
  0x94   : > { %v520_v6 = vmul.f32 %v488_v5, %v392_v0  ;;  %v521_v7 = vmul.f32 %v488_v5, %v393_v1  ;;  %1043 = vperm.xlu0 %2155, %v969_v2   ;;  %1048 = vperm.xlu1 %2156, %v970_v3   ;;  %v1549_v3 = vld [vmem:[%s3358_s7 + $0x60] sm:$0xff] }
  0x96   : > { %v649_v10 = vadd.f32 %v616_v4, %v521_v7  ;;  %v648_v11 = vadd.f32 %v616_v4, %v520_v6  ;;  %v1550_v6 = vld [vmem:[%s3358_s7 + $0x68] sm:$0xff]  ;;  %v378_v7 = vld [vmem:[%s2539_s15 + $0x80] sm:$0xff] }
  0x97   : > { %v483_v12 = vpop.permute.xlu0 %482  ;;  %v478_v15 = vpop.permute.xlu1 %477 }
  0x98   : > { %1555 = vperm.xlu0 %2155, %v1537_v8   ;;  %1560 = vperm.xlu1 %2156, %v1538_v9   ;;  %v518_v17 = vmul.f32 %v483_v12, %v390_v13  ;;  %v519_v18 = vmul.f32 %v483_v12, %v391_v14  ;;  %v516_v27 = vmul.f32 %v478_v15, %v388_v20  ;;  %v379_v8 = vld [vmem:[%s2539_s15 + $0x88] sm:$0xff]  ;;  %v1551_v13 = vld [vmem:[%s3358_s7 + $0x70] sm:$0xff] }
  0x99   : > { %666 = vmatprep.subr.mxu0 %v649_v10  ;;  %v517_v28 = vmul.f32 %v478_v15, %v389_v21 }
  0x9a   : > { %667 = vmatpush1.msra.mxu0 %v648_v11 }
  0x9b   : > { %v611_v22 = vpop.permute.xlu0 %610  ;;  %v473_v23 = vpop.permute.xlu1 %472 }
  0x9c   : > { %v646_v24 = vadd.f32 %v611_v22, %v518_v17  ;;  %v647_v25 = vadd.f32 %v611_v22, %v519_v18  ;;  %1565 = vperm.xlu0 %2155, %v1539_v16   ;;  %1570 = vperm.xlu1 %2156, %v1540_v19   ;;  %v514_v38 = vmul.f32 %v473_v23, %v386_v30  ;;  %v1552_v16 = vld [vmem:[%s3358_s7 + $0x78] sm:$0xff]  ;;  %v376_v17 = vld [vmem:[%s2539_s15 + $0x70] sm:$0xff] }
  0x9d   : > { %v515_v39 = vmul.f32 %v473_v23, %v387_v31  ;;  %v377_v18 = vld [vmem:[%s2539_s15 + $0x78] sm:$0xff]  ;;  %v1665_v23 = vld [vmem:[%s3359_s8] sm:$0xff] }
  0x9e   : > { %668 = vmatprep.subr.mxu0 %v647_v25 }
  0x9f   : > { %v606_v32 = vpop.permute.xlu0 %605  ;;  %v468_v33 = vpop.permute.xlu1 %467  ;;  %669 = vmatpush1.msra.mxu0 %v646_v24 }
  0xa0   : > { %v644_v34 = vadd.f32 %v606_v32, %v516_v27  ;;  %v645_v36 = vadd.f32 %v606_v32, %v517_v28  ;;  %1575 = vperm.xlu0 %2155, %v1541_v26   ;;  %1580 = vperm.xlu1 %2156, %v1542_v29   ;;  %v512_v48 = vmul.f32 %v468_v33, %v384_v41  ;;  %v1666_v26 = vld [vmem:[%s3359_s8 + $0x8] sm:$0xff]  ;;  %v374_v27 = vld [vmem:[%s2539_s15 + $0x60] sm:$0xff] }
  0xa1   : > { %v513_v49 = vmul.f32 %v468_v33, %v385_v42  ;;  %v375_v28 = vld [vmem:[%s2539_s15 + $0x68] sm:$0xff]  ;;  %v1667_v33 = vld [vmem:[%s3359_s8 + $0x10] sm:$0xff] }
  0xa2   : > { %670 = vmatprep.subr.mxu0 %v645_v36 }
  0xa3   : > { %v601_v43 = vpop.permute.xlu0 %600  ;;  %v463_v44 = vpop.permute.xlu1 %462  ;;  %671 = vmatpush1.msra.mxu0 %v644_v34 }
  0xa4   : > { %v642_v45 = vadd.f32 %v601_v43, %v514_v38  ;;  %v643_v46 = vadd.f32 %v601_v43, %v515_v39  ;;  %1585 = vperm.xlu0 %2155, %v1543_v37   ;;  %1590 = vperm.xlu1 %2156, %v1544_v40   ;;  %v510_v58 = vmul.f32 %v463_v44, %v382_v51  ;;  %v1668_v37 = vld [vmem:[%s3359_s8 + $0x18] sm:$0xff]  ;;  %v372_v38 = vld [vmem:[%s2539_s15 + $0x50] sm:$0xff] }
  0xa5   : > { %v511_v59 = vmul.f32 %v463_v44, %v383_v52  ;;  %v373_v39 = vld [vmem:[%s2539_s15 + $0x58] sm:$0xff]  ;;  %v1669_v44 = vld [vmem:[%s3359_s8 + $0x20] sm:$0xff] }
  0xa6   : > { %672 = vmatprep.subr.mxu0 %v643_v46 }
  0xa7   : > { %v596_v53 = vpop.permute.xlu0 %595  ;;  %v458_v54 = vpop.permute.xlu1 %457  ;;  %673 = vmatpush1.msra.mxu0 %v642_v45 }
  0xa8   : > { %v640_v55 = vadd.f32 %v596_v53, %v512_v48  ;;  %v641_v56 = vadd.f32 %v596_v53, %v513_v49  ;;  %1595 = vperm.xlu0 %2155, %v1545_v47   ;;  %1600 = vperm.xlu1 %2156, %v1546_v50   ;;  %v508_v4 = vmul.f32 %v458_v54, %v380_v61  ;;  %v1670_v47 = vld [vmem:[%s3359_s8 + $0x28] sm:$0xff]  ;;  %v370_v48 = vld [vmem:[%s2539_s15 + $0x40] sm:$0xff] }
  0xa9   : > { %v509_v5 = vmul.f32 %v458_v54, %v381_v62  ;;  %v371_v49 = vld [vmem:[%s2539_s15 + $0x48] sm:$0xff]  ;;  %v1671_v54 = vld [vmem:[%s3359_s8 + $0x30] sm:$0xff] }
  0xaa   : > { %674 = vmatprep.subr.mxu0 %v641_v56 }
  0xab   : > { %v591_v63 = vpop.permute.xlu0 %590  ;;  %v453_v0 = vpop.permute.xlu1 %452  ;;  %675 = vmatpush1.msra.mxu0 %v640_v55 }
  0xac   : > { %v638_v1 = vadd.f32 %v591_v63, %v510_v58  ;;  %v639_v2 = vadd.f32 %v591_v63, %v511_v59  ;;  %1605 = vperm.xlu0 %2155, %v1547_v57   ;;  %1610 = vperm.xlu1 %2156, %v1548_v60   ;;  %v506_v14 = vmul.f32 %v453_v0, %v378_v7  ;;  %v1672_v57 = vld [vmem:[%s3359_s8 + $0x38] sm:$0xff]  ;;  %v368_v58 = vld [vmem:[%s2539_s15 + $0x30] sm:$0xff] }
  0xad   : > { %v507_v15 = vmul.f32 %v453_v0, %v379_v8  ;;  %v369_v59 = vld [vmem:[%s2539_s15 + $0x38] sm:$0xff]  ;;  %v1673_v0 = vld [vmem:[%s3359_s8 + $0x40] sm:$0xff] }
  0xae   : > { %676 = vmatprep.subr.mxu0 %v639_v2 }
  0xaf   : > { %v586_v9 = vpop.permute.xlu0 %585  ;;  %v448_v10 = vpop.permute.xlu1 %447  ;;  %677 = vmatpush1.msra.mxu0 %v638_v1 }
  0xb0   : > { %v636_v11 = vadd.f32 %v586_v9, %v508_v4  ;;  %v637_v12 = vadd.f32 %v586_v9, %v509_v5  ;;  %1615 = vperm.xlu0 %2155, %v1549_v3   ;;  %1620 = vperm.xlu1 %2156, %v1550_v6   ;;  %v504_v24 = vmul.f32 %v448_v10, %v376_v17  ;;  %v1674_v3 = vld [vmem:[%s3359_s8 + $0x48] sm:$0xff]  ;;  %v366_v4 = vld [vmem:[%s2539_s15 + $0x20] sm:$0xff] }
  0xb1   : > { %v505_v25 = vmul.f32 %v448_v10, %v377_v18  ;;  %v367_v5 = vld [vmem:[%s2539_s15 + $0x28] sm:$0xff]  ;;  %v1675_v10 = vld [vmem:[%s3359_s8 + $0x50] sm:$0xff] }
  0xb2   : > { %678 = vmatprep.subr.mxu0 %v637_v12 }
  0xb3   : > { %v581_v19 = vpop.permute.xlu0 %580  ;;  %v443_v20 = vpop.permute.xlu1 %442  ;;  %679 = vmatpush1.msra.mxu0 %v636_v11 }
  0xb4   : > { %v634_v21 = vadd.f32 %v581_v19, %v506_v14  ;;  %v635_v22 = vadd.f32 %v581_v19, %v507_v15  ;;  %1625 = vperm.xlu0 %2155, %v1551_v13   ;;  %1630 = vperm.xlu1 %2156, %v1552_v16   ;;  %v502_v34 = vmul.f32 %v443_v20, %v374_v27  ;;  %v1676_v13 = vld [vmem:[%s3359_s8 + $0x58] sm:$0xff]  ;;  %v364_v14 = vld [vmem:[%s2539_s15 + $0x10] sm:$0xff] }
  0xb5   : > { %v503_v36 = vmul.f32 %v443_v20, %v375_v28  ;;  %v365_v15 = vld [vmem:[%s2539_s15 + $0x18] sm:$0xff]  ;;  %v363_v20 = vld [vmem:[%s2539_s15 + $0x8] sm:$0xff] }
  0xb6   : > { %680 = vmatprep.subr.mxu0 %v635_v22 }
  0xb7   : > { %v576_v29 = vpop.permute.xlu0 %575  ;;  %v438_v30 = vpop.permute.xlu1 %437  ;;  %681 = vmatpush1.msra.mxu0 %v634_v21  ;;  %v1677_v21 = vld [vmem:[%s3359_s8 + $0x60] sm:$0xff] }
  0xb8   : > { %v632_v31 = vadd.f32 %v576_v29, %v504_v24  ;;  %v633_v32 = vadd.f32 %v576_v29, %v505_v25  ;;  %1683 = vperm.xlu0 %2155, %v1665_v23   ;;  %1688 = vperm.xlu1 %2156, %v1666_v26   ;;  %v500_v45 = vmul.f32 %v438_v30, %v372_v38  ;;  %v362_v24 = vld [vmem:[%s2539_s15] sm:$0xff]  ;;  %v1678_v25 = vld [vmem:[%s3359_s8 + $0x68] sm:$0xff] }
  0xb9   : > { %v501_v46 = vmul.f32 %v438_v30, %v373_v39  ;;  %v651_v38 = vld [vmem:[%s3354_s3 + $0x8] sm:$0xff]  ;;  %v652_v39 = vld [vmem:[%s3354_s3 + $0x10] sm:$0xff] }
  0xba   : > { %682 = vmatprep.subr.mxu0 %v633_v32  ;;  %v1679_v32 = vld [vmem:[%s3359_s8 + $0x70] sm:$0xff] }
  0xbb   : > { %v571_v40 = vpop.permute.xlu0 %570  ;;  %v433_v41 = vpop.permute.xlu1 %432  ;;  %683 = vmatpush1.msra.mxu0 %v632_v31 }
  0xbc   : > { %v630_v42 = vadd.f32 %v571_v40, %v502_v34  ;;  %v631_v43 = vadd.f32 %v571_v40, %v503_v36  ;;  %1693 = vperm.xlu0 %2155, %v1667_v33   ;;  %1698 = vperm.xlu1 %2156, %v1668_v37   ;;  %v498_v55 = vmul.f32 %v433_v41, %v370_v48  ;;  %v1680_v34 = vld [vmem:[%s3359_s8 + $0x78] sm:$0xff]  ;;  %v650_v37 = vld [vmem:[%s3354_s3] sm:$0xff] }
  0xbd   : > { %v499_v56 = vmul.f32 %v433_v41, %v371_v49  ;;  %v653_v40 = vld [vmem:[%s3354_s3 + $0x18] sm:$0xff]  ;;  %v654_v41 = vld [vmem:[%s3354_s3 + $0x20] sm:$0xff] }
  0xbe   : > { %684 = vmatprep.subr.mxu0 %v631_v43  ;;  %v656_v43 = vld [vmem:[%s3354_s3 + $0x30] sm:$0xff]  ;;  %v661_v48 = vld [vmem:[%s3354_s3 + $0x58] sm:$0xff]  ;;  %v662_v49 = vld [vmem:[%s3354_s3 + $0x60] sm:$0xff] }
  0xbf   : > { %v566_v50 = vpop.permute.xlu0 %565  ;;  %v428_v51 = vpop.permute.xlu1 %427  ;;  %685 = vmatpush1.msra.mxu0 %v630_v42  ;;  %v655_v42 = vld [vmem:[%s3354_s3 + $0x28] sm:$0xff] }
  0xc0   : > { %v628_v52 = vadd.f32 %v566_v50, %v500_v45  ;;  %v629_v53 = vadd.f32 %v566_v50, %v501_v46  ;;  %1703 = vperm.xlu0 %2155, %v1669_v44   ;;  %1708 = vperm.xlu1 %2156, %v1670_v47   ;;  %v496_v1 = vmul.f32 %v428_v51, %v368_v58  ;;  %v657_v44 = vld [vmem:[%s3354_s3 + $0x38] sm:$0xff]  ;;  %v658_v45 = vld [vmem:[%s3354_s3 + $0x40] sm:$0xff]  ;;  %v659_v46 = vld [vmem:[%s3354_s3 + $0x48] sm:$0xff] }
  0xc1   : > { %v497_v2 = vmul.f32 %v428_v51, %v369_v59  ;;  %v660_v47 = vld [vmem:[%s3354_s3 + $0x50] sm:$0xff]  ;;  %v663_v50 = vld [vmem:[%s3354_s3 + $0x68] sm:$0xff] }
  0xc2   : > { %686 = vmatprep.subr.mxu0 %v629_v53  ;;  %v664_v51 = vld [vmem:[%s3354_s3 + $0x70] sm:$0xff] }
  0xc3   : > { %v561_v60 = vpop.permute.xlu0 %560  ;;  %v423_v61 = vpop.permute.xlu1 %422  ;;  %687 = vmatpush1.msra.mxu0 %v628_v52  ;;  %v665_v52 = vld [vmem:[%s3354_s3 + $0x78] sm:$0xff] }
  0xc4   : > { %v626_v62 = vadd.f32 %v561_v60, %v498_v55  ;;  %v627_v63 = vadd.f32 %v561_v60, %v499_v56  ;;  %1713 = vperm.xlu0 %2155, %v1671_v54   ;;  %1718 = vperm.xlu1 %2156, %v1672_v57   ;;  %v494_v11 = vmul.f32 %v423_v61, %v366_v4 }
  0xc5   : > { %v495_v12 = vmul.f32 %v423_v61, %v367_v5 }
  0xc6   : > { %688 = vmatprep.subr.mxu0 %v627_v63 }
  0xc7   : > { %v556_v6 = vpop.permute.xlu0 %555  ;;  %v418_v7 = vpop.permute.xlu1 %417  ;;  %689 = vmatpush1.msra.mxu0 %v626_v62 }
  0xc8   : > { %v624_v8 = vadd.f32 %v556_v6, %v496_v1  ;;  %v625_v9 = vadd.f32 %v556_v6, %v497_v2  ;;  %1723 = vperm.xlu0 %2155, %v1673_v0   ;;  %1728 = vperm.xlu1 %2156, %v1674_v3   ;;  %v492_v22 = vmul.f32 %v418_v7, %v364_v14 }
  0xc9   : > { %v493_v23 = vmul.f32 %v418_v7, %v365_v15 }
  0xca   : > { %690 = vmatprep.subr.mxu0 %v625_v9 }
  0xcb   : > { %v551_v16 = vpop.permute.xlu0 %550  ;;  %v413_v17 = vpop.permute.xlu1 %412  ;;  %691 = vmatpush1.msra.mxu0 %v624_v8 }
  0xcc   : > { %v622_v18 = vadd.f32 %v551_v16, %v494_v11  ;;  %v623_v19 = vadd.f32 %v551_v16, %v495_v12  ;;  %1733 = vperm.xlu0 %2155, %v1675_v10   ;;  %1738 = vperm.xlu1 %2156, %v1676_v13   ;;  %v491_v28 = vmul.f32 %v413_v17, %v363_v20 }
  0xcd   : > { %v490_v31 = vmul.f32 %v413_v17, %v362_v24 }
  0xce   : > { %692 = vmatprep.subr.mxu0 %v623_v19 }
  0xcf   : > { %v546_v26 = vpop.permute.xlu0 %545  ;;  %v541_v27 = vpop.permute.xlu1 %540  ;;  %693 = vmatpush1.msra.mxu0 %v622_v18 }
  0xd0   : > { %v620_v29 = vadd.f32 %v546_v26, %v492_v22  ;;  %v621_v30 = vadd.f32 %v546_v26, %v493_v23  ;;  %1743 = vperm.xlu0 %2155, %v1677_v21   ;;  %1748 = vperm.xlu1 %2156, %v1678_v25   ;;  %v619_v33 = vadd.f32 %v541_v27, %v491_v28 }
  0xd1   : > { %v618_v36 = vadd.f32 %v541_v27, %v490_v31 }
  0xd2   : > { %694 = vmatprep.subr.mxu0 %v621_v30 }
  0xd3   : > { %695 = vmatpush1.msra.mxu0 %v620_v29  ;;  %v846_v53 = vpop.permute.xlu0 %845  ;;  %v851_v54 = vpop.permute.xlu1 %850 }
  0xd4   : > { %1753 = vperm.xlu0 %2155, %v1679_v32   ;;  %696 = vmatprep.subr.mxu0 %v619_v33 }
  0xd5   : > { %1758 = vperm.xlu1 %2156, %v1680_v34   ;;  %697 = vmatpush1.msra.mxu0 %v618_v36 }
  0xd6   : > { %731 = vmatmul.mubr.f32.vlgmr.msra.gmra.mxu0 %v650_v37 }
  0xd7   : > { %736 = vmatprep.mubr.f32.mxu0 %v2236_v35  ;;  %v856_v55 = vpop.permute.xlu0 %855  ;;  %v861_v56 = vpop.permute.xlu1 %860 }
  0xda   : > { %737 = vmatmul.mubr.f32.gmra.mxu0 %v651_v38 }
  0xdb   : > { %742 = vmatprep.mubr.f32.mxu0 %v2236_v35  ;;  %v866_v57 = vpop.permute.xlu0 %865  ;;  %v871_v58 = vpop.permute.xlu1 %870 }
  0xde   : > { %743 = vmatmul.mubr.f32.gmra.mxu0 %v652_v39 }
  0xdf   : > { %748 = vmatprep.mubr.f32.mxu0 %v2236_v35  ;;  %v2738_v59 = vpop.permute.xlu0 %973  ;;  %v2740_v60 = vpop.permute.xlu1 %978 }
  0xe2   : > { %749 = vmatmul.mubr.f32.gmra.mxu0 %v653_v40 }
  0xe3   : > { %754 = vmatprep.mubr.f32.mxu0 %v2236_v35  ;;  %v984_v61 = vpop.permute.xlu0 %983  ;;  %v989_v62 = vpop.permute.xlu1 %988 }
  0xe6   : > { %755 = vmatmul.mubr.f32.gmra.mxu0 %v654_v41 }
  0xe7   : > { %760 = vmatprep.mubr.f32.mxu0 %v2236_v35  ;;  %v876_v63 = vpop.permute.xlu0 %875  ;;  %v2742_v1 = vpop.permute.xlu1 %880 }
  0xea   : > { %761 = vmatmul.mubr.f32.gmra.mxu0 %v655_v42 }
  0xeb   : > { %766 = vmatprep.mubr.f32.mxu0 %v2236_v35  ;;  %v994_v4 = vpop.permute.xlu0 %993  ;;  %v2744_v6 = vpop.permute.xlu1 %998 }
  0xee   : > { %767 = vmatmul.mubr.f32.gmra.mxu0 %v656_v43 }
  0xef   : > { %772 = vmatprep.mubr.f32.mxu0 %v2236_v35  ;;  %v2746_v9 = vpop.permute.xlu0 %885  ;;  %v2748_v11 = vpop.permute.xlu1 %890 }
  0xf2   : > { %773 = vmatmul.mubr.f32.gmra.mxu0 %v657_v44 }
  0xf3   : > { %778 = vmatprep.mubr.f32.mxu0 %v2236_v35  ;;  %v2750_v14 = vpop.permute.xlu0 %1003  ;;  %v2752_v16 = vpop.permute.xlu1 %1008 }
  0xf6   : > { %779 = vmatmul.mubr.f32.gmra.mxu0 %v658_v45 }
  0xf7   : > { %784 = vmatprep.mubr.f32.mxu0 %v2236_v35  ;;  %v2754_v19 = vpop.permute.xlu0 %895  ;;  %v2756_v21 = vpop.permute.xlu1 %900 }
  0xfa   : > { %785 = vmatmul.mubr.f32.gmra.mxu0 %v659_v46 }
  0xfb   : > { %790 = vmatprep.mubr.f32.mxu0 %v2236_v35  ;;  %v2758_v24 = vpop.permute.xlu0 %1013  ;;  %v2760_v26 = vpop.permute.xlu1 %1018 }
  0xfe   : > { %791 = vmatmul.mubr.f32.gmra.mxu0 %v660_v47 }
  0xff   : > { %796 = vmatprep.mubr.f32.mxu0 %v2236_v35  ;;  %v2762_v29 = vpop.permute.xlu0 %905  ;;  %v2764_v31 = vpop.permute.xlu1 %910 }
 0x102   : > { %797 = vmatmul.mubr.f32.gmra.mxu0 %v661_v48 }
 0x103   : > { %802 = vmatprep.mubr.f32.mxu0 %v2236_v35  ;;  %v2766_v37 = vpop.permute.xlu0 %1023  ;;  %v2768_v45 = vpop.permute.xlu1 %1028 }
 0x106   : > { %803 = vmatmul.mubr.f32.gmra.mxu0 %v662_v49 }
 0x107   : > { %808 = vmatprep.mubr.f32.mxu0 %v2236_v35 }
 0x10a   : > { %809 = vmatmul.mubr.f32.gmra.mxu0 %v663_v50 }
 0x10b   : > { %814 = vmatprep.mubr.f32.mxu0 %v2236_v35 }
 0x10e   : > { %815 = vmatmul.mubr.f32.gmra.mxu0 %v664_v51 }
 0x10f   : > { %820 = vmatprep.mubr.f32.mxu0 %v2236_v35 }
 0x112   : > { %821 = vmatmul.mubr.f32.gmra.mxu0 %v665_v52 }
 0x196   : > { %v732_v0 = vpop.f32.mrf.mxu0 }
 0x197   : > { %v923_v38 = vmul.f32 %v846_v53, %v732_v0 }
 0x198   : > { %v734_v2 = vpop.f32.mrf.mxu0 }
 0x199   : > { %v924_v43 = vmul.f32 %v846_v53, %v734_v2  ;;  %v2775_v0 = vadd.f32 %v2738_v59, %v923_v38 }
 0x19a   : > { %v738_v3 = vpop.f32.mrf.mxu0 }
 0x19b   : > { %v925_v46 = vmul.f32 %v851_v54, %v738_v3 }
 0x19c   : > { %v740_v5 = vpop.f32.mrf.mxu0 }
 0x19d   : > { %v926_v47 = vmul.f32 %v851_v54, %v740_v5  ;;  %v2784_v54 = vadd.f32 %v2738_v59, %v924_v43  ;;  %v2790_v5 = vadd.f32 %v2740_v60, %v925_v46 }
 0x19e   : > { %v744_v7 = vpop.f32.mrf.mxu0 }
 0x19f   : > { %v927_v33 = vmul.f32 %v856_v55, %v744_v7 }
 0x1a0   : > { %v746_v8 = vpop.f32.mrf.mxu0 }
 0x1a1   : > { %v928_v36 = vmul.f32 %v856_v55, %v746_v8  ;;  %v2770_v48 = vadd.f32 %v984_v61, %v927_v33  ;;  %v2793_v8 = vadd.f32 %v2740_v60, %v926_v47  ;;  %v2809_v60 = vpop.permute.xlu1 %920 }
 0x1a2   : > { %v750_v10 = vpop.f32.mrf.mxu0 }
 0x1a3   : > { %v929_v39 = vmul.f32 %v861_v56, %v750_v10  ;;  %v2772_v51 = vadd.f32 %v984_v61, %v928_v36 }
 0x1a4   : > { %v752_v12 = vpop.f32.mrf.mxu0 }
 0x1a5   : > { %v930_v40 = vmul.f32 %v861_v56, %v752_v12  ;;  %v2777_v56 = vadd.f32 %v989_v62, %v929_v39 }
 0x1a6   : > { %v756_v13 = vpop.f32.mrf.mxu0 }
 0x1a7   : > { %v931_v41 = vmul.f32 %v866_v57, %v756_v13  ;;  %v2779_v7 = vadd.f32 %v989_v62, %v930_v40  ;;  %v1083_v62 = vmax.f32 %v2775_v0, %v2770_v48 }
 0x1a8   : > { %v758_v15 = vpop.f32.mrf.mxu0 }
 0x1a9   : > { %v932_v44 = vmul.f32 %v866_v57, %v758_v15  ;;  %v2781_v53 = vadd.f32 %v994_v4, %v931_v41  ;;  %v1084_v15 = vmax.f32 %v2790_v5, %v2777_v56 }
 0x1aa   : > { %v762_v17 = vpop.f32.mrf.mxu0 }
 0x1ab   : > { %v933_v49 = vmul.f32 %v871_v58, %v762_v17  ;;  %v2786_v2 = vadd.f32 %v994_v4, %v932_v44  ;;  %v1104_v4 = vmax.f32 %v2784_v54, %v2772_v51  ;;  %v1105_v17 = vmax.f32 %v2793_v8, %v2779_v7 }
 0x1ac   : > { %v764_v18 = vpop.f32.mrf.mxu0 }
 0x1ad   : > { %v934_v52 = vmul.f32 %v871_v58, %v764_v18  ;;  %v916_v58 = vpop.permute.xlu0 %915  ;;  %v2798_v10 = vadd.f32 %v2744_v6, %v933_v49  ;;  %v1085_v18 = vmax.f32 %v1083_v62, %v2781_v53  ;;  %v1039_v49 = vpop.permute.xlu1 %1038 }
 0x1ae   : > { %v768_v20 = vpop.f32.mrf.mxu0 }
 0x1af   : > { %v935_v55 = vmul.f32 %v876_v63, %v768_v20  ;;  %v1086_v33 = vmax.f32 %v1084_v15, %v2798_v10 }
 0x1b0   : > { %v770_v22 = vpop.f32.mrf.mxu0 }
 0x1b1   : > { %v936_v3 = vmul.f32 %v876_v63, %v770_v22  ;;  %v2803_v63 = vadd.f32 %v2744_v6, %v934_v52  ;;  %v2806_v12 = vadd.f32 %v2750_v14, %v935_v55  ;;  %v1106_v6 = vmax.f32 %v1104_v4, %v2786_v2  ;;  %v1034_v44 = vpop.permute.xlu0 %1033 }
 0x1b2   : > { %v774_v23 = vpop.f32.mrf.mxu0 }
 0x1b3   : > { %v937_v61 = vmul.f32 %v2742_v1, %v774_v23  ;;  %v2819_v23 = vadd.f32 %v2750_v14, %v936_v3  ;;  %v1107_v40 = vmax.f32 %v1105_v17, %v2803_v63  ;;  %v1087_v41 = vmax.f32 %v1085_v18, %v2806_v12 }
 0x1b4   : > { %v776_v25 = vpop.f32.mrf.mxu0 }
 0x1b5   : > { %v938_v13 = vmul.f32 %v2742_v1, %v776_v25  ;;  %v2822_v1 = vadd.f32 %v2752_v16, %v937_v61  ;;  %v1044_v17 = vpop.permute.xlu0 %1043 }
 0x1b6   : > { %v780_v27 = vpop.f32.mrf.mxu0 }
 0x1b7   : > { %v939_v20 = vmul.f32 %v2746_v9, %v780_v27  ;;  %v2832_v14 = vadd.f32 %v2752_v16, %v938_v13  ;;  %v1088_v46 = vmax.f32 %v1086_v33, %v2822_v1 }
 0x1b8   : > { %v782_v28 = vpop.f32.mrf.mxu0 }
 0x1b9   : > { %v940_v36 = vmul.f32 %v2746_v9, %v782_v28  ;;  %v1109_v55 = vmax.f32 %v1107_v40, %v2832_v14 }
 0x1ba   : > { %v786_v30 = vpop.f32.mrf.mxu0 }
 0x1bb   : > { %v941_v25 = vmul.f32 %v2748_v11, %v786_v30  ;;  %v2836_v30 = vadd.f32 %v2758_v24, %v939_v20 }
 0x1bc   : > { %v788_v32 = vpop.f32.mrf.mxu0 }
 0x1bd   : > { %v942_v38 = vmul.f32 %v2748_v11, %v788_v32  ;;  %v2844_v16 = vadd.f32 %v2760_v26, %v941_v25 }
 0x1be   : > { %v792_v34 = vpop.f32.mrf.mxu0 }
 0x1bf   : > { %v943_v39 = vmul.f32 %v2754_v19, %v792_v34  ;;  %v1108_v34 = vmax.f32 %v1106_v6, %v2819_v23  ;;  %v1090_v4 = vmax.f32 %v1088_v46, %v2844_v16 }
 0x1c0   : > { %v794_v42 = vpop.f32.mrf.mxu0 }
 0x1c1   : > { %v944_v9 = vmul.f32 %v2754_v19, %v794_v42  ;;  %v2851_v19 = vadd.f32 %v2760_v26, %v942_v38 }
 0x1c2   : > { %v798_v50 = vpop.f32.mrf.mxu0 }
 0x1c3   : > { %v945_v43 = vmul.f32 %v2756_v21, %v798_v50  ;;  %v2848_v50 = vadd.f32 %v2758_v24, %v940_v36  ;;  %v1089_v24 = vmax.f32 %v1087_v41, %v2836_v30  ;;  %v2864_v62 = vadd.f32 %v2766_v37, %v944_v9  ;;  %v1049_v36 = vpop.permute.xlu1 %1048 }
 0x1c4   : > { %v800_v57 = vpop.f32.mrf.mxu0  ;;  %v1111_v18 = vmax.f32 %v1109_v55, %v2851_v19  ;;  %v1125_v55 = vlaneseq }
 0x1c5   : > { %v946_v11 = vmul.f32 %v2756_v21, %v800_v57  ;;  %v2854_v21 = vadd.f32 %v2766_v37, %v943_v39  ;;  %v2859_v57 = vadd.f32 %v2768_v45, %v945_v43 }
 0x1c6   : > { %v804_v59 = vpop.f32.mrf.mxu0 }
 0x1c7   : > { %v947_v28 = vmul.f32 %v2762_v29, %v804_v59  ;;  %v2867_v26 = vadd.f32 %v2768_v45, %v946_v11  ;;  %v1091_v20 = vmax.f32 %v1089_v24, %v2854_v21  ;;  %v1092_v45 = vmax.f32 %v1090_v4, %v2859_v57 }
 0x1c8   : > { %v806_v22 = vpop.f32.mrf.mxu0  ;;  %v1126_v24 = vshrl.u32 %v1125_v55, 7 }
 0x1c9   : > { %v948_v42 = vmul.f32 %v2762_v29, %v806_v22  ;;  %v2869_v59 = vadd.f32 %v1034_v44, %v947_v28  ;;  %v1113_v38 = vmax.f32 %v1111_v18, %v2867_v26 }
 0x1ca   : > { %v810_v27 = vpop.f32.mrf.mxu0  ;;  %v1129_v18 = vadd.s32 24, %v1126_v24 }
 0x1cb   : > { %v949_v47 = vmul.f32 %v2764_v31, %v810_v27  ;;  %v2877_v37 = vadd.f32 %v1034_v44, %v948_v42  ;;  %v1093_v39 = vmax.f32 %v1091_v20, %v2869_v59 }
 0x1cc   : > { %v812_v32 = vpop.f32.mrf.mxu0 }
 0x1cd   : > { %v950_v3 = vmul.f32 %v2764_v31, %v812_v32  ;;  %v2872_v13 = vadd.f32 %v1039_v49, %v949_v47  ;;  %v1110_v31 = vmax.f32 %v1108_v34, %v2848_v50 }
 0x1ce   : > { %v816_v52 = vpop.f32.mrf.mxu0 }
 0x1cf   : > { %v951_v61 = vmul.f32 %v916_v58, %v816_v52  ;;  %v2880_v6 = vadd.f32 %v1039_v49, %v950_v3  ;;  %v1094_v40 = vmax.f32 %v1092_v45, %v2872_v13  ;;  %v1130_v45 = vadd.s32 32, %v1126_v24 }
 0x1d0   : > { %v818_v29 = vpop.f32.mrf.mxu0 }
 0x1d1   : > { %v952_v15 = vmul.f32 %v916_v58, %v818_v29  ;;  %v2882_v25 = vadd.f32 %v1044_v17, %v951_v61  ;;  %v1112_v58 = vmax.f32 %v1110_v31, %v2864_v62  ;;  %v1115_v11 = vmax.f32 %v1113_v38, %v2880_v6 }
 0x1d2   : > { %v822_v22 = vpop.f32.mrf.mxu0  ;;  %v1128_v31 = vadd.s32 16, %v1126_v24  ;;  %v1134_v38 = vadd.s32 64, %v1126_v24 }
 0x1d3   : > { %v953_v33 = vmul.f32 %v2809_v60, %v822_v22  ;;  %v2889_v41 = vadd.f32 %v1044_v17, %v952_v15  ;;  %v1114_v9 = vmax.f32 %v1112_v58, %v2877_v37  ;;  %v1095_v28 = vmax.f32 %v1093_v39, %v2882_v25 }
 0x1d4   : > { %v824_v27 = vpop.f32.mrf.mxu0  ;;  %v1127_v17 = vadd.s32 8, %v1126_v24  ;;  %v1133_v58 = vadd.s32 56, %v1126_v24  ;;  %v1135_v39 = vadd.s32 72, %v1126_v24 }
 0x1d5   : > { %v2891_v43 = vadd.f32 %v1049_v36, %v953_v33  ;;  %v954_v44 = vmul.f32 %v2809_v60, %v824_v27  ;;  %v1116_v46 = vmax.f32 %v1114_v9, %v2889_v41  ;;  %v1131_v33 = vadd.s32 40, %v1126_v24 }
 0x1d6   : > { %v1136_v27 = vadd.s32 80, %v1126_v24  ;;  %v2906_v9 = vcvt.s32.f32 %v1127_v17 }
 0x1d7   : > { %v1096_v32 = vmax.f32 %v1094_v40, %v2891_v43  ;;  %v2898_v34 = vadd.f32 %v1049_v36, %v954_v44  ;;  %v1132_v36 = vadd.s32 48, %v1126_v24  ;;  %v1137_v40 = vadd.s32 88, %v1126_v24 }
 0x1d8   : > { %v2904_v44 = vcvt.s32.f32 %v1126_v24  ;;  %v2922_v55 = vcvt.s32.f32 %v1131_v33 }
 0x1d9   : > { %v1097_v47 = vmax.f32 %v1095_v28, %v1096_v32  ;;  %v1117_v49 = vmax.f32 %v1115_v11, %v2898_v34  ;;  %v2908_v11 = vcvt.s32.f32 %v1128_v31  ;;  %v2910_v28 = vcvt.s32.f32 %v1129_v18 }
 0x1db   : > { %v1098_v42 = vrot.slane %v1097_v47, 4  ;;  %v1118_v52 = vmax.f32 %v1116_v46, %v1117_v49  ;;  %v1138_v46 = vadd.s32 96, %v1126_v24  ;;  %v1140_v49 = vadd.s32 112, %v1126_v24 }
 0x1dd   : > { %v1099_v3 = vmax.f32 %v1097_v47, %v1098_v42  ;;  %v1119_v60 = vrot.slane %v1118_v52, 4  ;;  %v1139_v47 = vadd.s32 104, %v1126_v24  ;;  %v1141_v42 = vadd.s32 120, %v1126_v24 }
 0x1de   : > { %v2944_v17 = vcvt.s32.f32 %v1138_v46 }
 0x1df   : > { %v1100_v61 = vrot.slane %v1099_v3, 2  ;;  %v1120_v29 = vmax.f32 %v1118_v52, %v1119_v60  ;;  %v2920_v52 = vcvt.s32.f32 %v1130_v45  ;;  %v2950_v18 = vcvt.s32.f32 %v1139_v47 }
 0x1e1   : > { %v1101_v4 = vmax.f32 %v1099_v3, %v1100_v61  ;;  %v1121_v20 = vrot.slane %v1120_v29, 2  ;;  %v2924_v3 = vcvt.s32.f32 %v1132_v36  ;;  %v2932_v61 = vcvt.s32.f32 %v1134_v38 }
 0x1e2   : > { %v2960_v36 = vcvt.s32.f32 %v1140_v49 }
 0x1e3   : > { %v1102_v15 = vrot.slane %v1101_v4, 1  ;;  %v1122_v32 = vmax.f32 %v1120_v29, %v1121_v20  ;;  %v2938_v29 = vcvt.s32.f32 %v1135_v39 }
 0x1e5   : > { %v2902_v22 = vmax.f32 %v1101_v4, %v1102_v15  ;;  %v1123_v24 = vrot.slane %v1122_v32, 1  ;;  %v2940_v4 = vcvt.s32.f32 %v1136_v27  ;;  %v2942_v15 = vcvt.s32.f32 %v1137_v40 }
 0x1e7   : > { %vm1158_vm0 = vcmp.eq.f32.partialorder %v2775_v0, %v2902_v22  ;;  %vm1160_vm1 = vcmp.eq.f32.partialorder %v2790_v5, %v2902_v22  ;;  %vm1162_vm2 = vcmp.eq.f32.partialorder %v2770_v48, %v2902_v22  ;;  %vm1164_vm3 = vcmp.eq.f32.partialorder %v2777_v56, %v2902_v22 }
 0x1e8   : > { %v2926_v0 = vcvt.s32.f32 %v1133_v58  ;;  %v1190_v5 = vsel %vm1158_vm0, %v2904_v44, 128.0  ;;  %v1192_v60 = vsel %vm1160_vm1, %v2906_v9, 128.0  ;;  %v1194_v48 = vsel %vm1162_vm2, %v2908_v11, 128.0 }
 0x1e9   : > { %v1196_v56 = vsel %vm1164_vm3, %v2910_v28, 128.0  ;;  %vm1166_vm4 = vcmp.eq.f32.partialorder %v2781_v53, %v2902_v22  ;;  %vm1168_vm5 = vcmp.eq.f32.partialorder %v2798_v10, %v2902_v22  ;;  %vm1170_vm6 = vcmp.eq.f32.partialorder %v2806_v12, %v2902_v22 }
 0x1ea   : > { %vm1172_vm7 = vcmp.eq.f32.partialorder %v2822_v1, %v2902_v22  ;;  %v1222_v31 = vmin.f32 %v1190_v5, %v1194_v48  ;;  %v1223_v53 = vmin.f32 %v1192_v60, %v1196_v56  ;;  %vm1174_vm8 = vcmp.eq.f32.partialorder %v2836_v30, %v2902_v22 }
 0x1eb   : > { %v1198_v10 = vsel %vm1166_vm4, %v2920_v52, 128.0  ;;  %v1200_v20 = vsel %vm1168_vm5, %v2922_v55, 128.0  ;;  %vm1176_vm9 = vcmp.eq.f32.partialorder %v2844_v16, %v2902_v22  ;;  %v2958_v12 = vmax.f32 %v1122_v32, %v1123_v24 }
 0x1ec   : > { %v1224_v45 = vmin.f32 %v1222_v31, %v1198_v10  ;;  %v1225_v33 = vmin.f32 %v1223_v53, %v1200_v20  ;;  %v2962_v1 = vcvt.s32.f32 %v1141_v42  ;;  %v1202_v58 = vsel %vm1170_vm6, %v2924_v3, 128.0 }
 0x1ed   : > { %v1204_v38 = vsel %vm1172_vm7, %v2926_v0, 128.0  ;;  %vm1178_vm10 = vcmp.eq.f32.partialorder %v2854_v21, %v2902_v22  ;;  %vm1180_vm11 = vcmp.eq.f32.partialorder %v2859_v57, %v2902_v22  ;;  %vm1182_vm12 = vcmp.eq.f32.partialorder %v2869_v59, %v2902_v22 }
 0x1ee   : > { %v1226_v39 = vmin.f32 %v1224_v45, %v1202_v58  ;;  %v1227_v16 = vmin.f32 %v1225_v33, %v1204_v38  ;;  %vm1184_vm13 = vcmp.eq.f32.partialorder %v2872_v13, %v2902_v22  ;;  %v1206_v27 = vsel %vm1174_vm8, %v2932_v61, 128.0 }
 0x1ef   : > { %v1208_v40 = vsel %vm1176_vm9, %v2938_v29, 128.0  ;;  %vm1159_vm14 = vcmp.eq.f32.partialorder %v2784_v54, %v2958_v12  ;;  %vm1161_vm15 = vcmp.eq.f32.partialorder %v2793_v8, %v2958_v12  ;;  %v1210_v57 = vsel %vm1178_vm10, %v2940_v4, 128.0 }
 0x1f0   : > { %v1228_v32 = vmin.f32 %v1226_v39, %v1206_v27  ;;  %v1229_v21 = vmin.f32 %v1227_v16, %v1208_v40  ;;  %v1212_v46 = vsel %vm1180_vm11, %v2942_v15, 128.0  ;;  %vm1163_vm0 = vcmp.eq.f32.partialorder %v2772_v51, %v2958_v12 }
 0x1f1   : > { %vm1165_vm1 = vcmp.eq.f32.partialorder %v2779_v7, %v2958_v12  ;;  %vm1186_vm2 = vcmp.eq.f32.partialorder %v2882_v25, %v2902_v22  ;;  %vm1188_vm3 = vcmp.eq.f32.partialorder %v2891_v43, %v2902_v22  ;;  %v1214_v8 = vsel %vm1182_vm12, %v2944_v17, 128.0 }
 0x1f2   : > { %v1230_v54 = vmin.f32 %v1228_v32, %v1210_v57  ;;  %v1231_v30 = vmin.f32 %v1229_v21, %v1212_v46  ;;  %v1216_v51 = vsel %vm1184_vm13, %v2950_v18, 128.0  ;;  %v1191_v7 = vsel %vm1159_vm14, %v2904_v44, 128.0 }
 0x1f3   : > { %v1193_v47 = vsel %vm1161_vm15, %v2906_v9, 128.0  ;;  %v1195_v43 = vsel %vm1163_vm0, %v2908_v11, 128.0  ;;  %v1197_v42 = vsel %vm1165_vm1, %v2910_v28, 128.0  ;;  %v1218_v5 = vsel %vm1186_vm2, %v2960_v36, 128.0 }
 0x1f4   : > { %v1232_v25 = vmin.f32 %v1230_v54, %v1214_v8  ;;  %v1233_v49 = vmin.f32 %v1231_v30, %v1216_v51  ;;  %v1220_v59 = vsel %vm1188_vm3, %v2962_v1, 128.0  ;;  %vm1167_vm4 = vcmp.eq.f32.partialorder %v2786_v2, %v2958_v12 }
 0x1f5   : > { %vm1169_vm5 = vcmp.eq.f32.partialorder %v2803_v63, %v2958_v12  ;;  %vm1171_vm6 = vcmp.eq.f32.partialorder %v2819_v23, %v2958_v12  ;;  %vm1173_vm7 = vcmp.eq.f32.partialorder %v2832_v14, %v2958_v12  ;;  %v1243_v60 = vmin.f32 %v1191_v7, %v1195_v43  ;;  %v1556_v43 = vpop.permute.xlu0 %1555 }
 0x1f6   : > { %v1234_v13 = vmin.f32 %v1232_v25, %v1218_v5  ;;  %v1235_v22 = vmin.f32 %v1233_v49, %v1220_v59  ;;  %v1244_v48 = vmin.f32 %v1193_v47, %v1197_v42  ;;  %v1199_v24 = vsel %vm1167_vm4, %v2920_v52, 128.0  ;;  %v1561_v42 = vpop.permute.xlu1 %1560 }
 0x1f7   : > { %v1201_v31 = vsel %vm1169_vm5, %v2922_v55, 128.0  ;;  %vm1175_vm8 = vcmp.eq.f32.partialorder %v2848_v50, %v2958_v12  ;;  %vm1177_vm9 = vcmp.eq.f32.partialorder %v2851_v19, %v2958_v12  ;;  %v1245_v2 = vmin.f32 %v1243_v60, %v1199_v24 }
 0x1f8   : > { %v1236_v56 = vmin.f32 %v1234_v13, %v1235_v22  ;;  %v1246_v63 = vmin.f32 %v1244_v48, %v1201_v31  ;;  %v1203_v23 = vsel %vm1171_vm6, %v2924_v3, 128.0  ;;  %v1205_v53 = vsel %vm1173_vm7, %v2926_v0, 128.0 }
 0x1f9   : > { %vm1179_vm10 = vcmp.eq.f32.partialorder %v2864_v62, %v2958_v12  ;;  %vm1181_vm11 = vcmp.eq.f32.partialorder %v2867_v26, %v2958_v12  ;;  %v1247_v14 = vmin.f32 %v1245_v2, %v1203_v23  ;;  %v1207_v50 = vsel %vm1175_vm8, %v2932_v61, 128.0  ;;  %v1566_v5 = vpop.permute.xlu0 %1565 }
 0x1fa   : > { %v1248_v10 = vmin.f32 %v1246_v63, %v1205_v53  ;;  %v1237_v20 = vrot.slane %v1236_v56, 4  ;;  %v1209_v45 = vsel %vm1177_vm9, %v2938_v29, 128.0  ;;  %vm1183_vm12 = vcmp.eq.f32.partialorder %v2877_v37, %v2958_v12  ;;  %v3206_v59 = vpop.permute.xlu1 %1570 }
 0x1fb   : > { %vm1185_vm13 = vcmp.eq.f32.partialorder %v2880_v6, %v2958_v12  ;;  %v1249_v19 = vmin.f32 %v1247_v14, %v1207_v50  ;;  %v1211_v62 = vsel %vm1179_vm10, %v2940_v4, 128.0  ;;  %v1213_v58 = vsel %vm1181_vm11, %v2942_v15, 128.0 }
 0x1fc   : > { %v1250_v33 = vmin.f32 %v1248_v10, %v1209_v45  ;;  %vm1187_vm14 = vcmp.eq.f32.partialorder %v2889_v41, %v2958_v12  ;;  %vm1189_vm15 = vcmp.eq.f32.partialorder %v2898_v34, %v2958_v12  ;;  %v1238_v39 = vmin.f32 %v1236_v56, %v1237_v20 }
 0x1fd   : > { %v1251_v26 = vmin.f32 %v1249_v19, %v1211_v62  ;;  %v1215_v37 = vsel %vm1183_vm12, %v2944_v17, 128.0  ;;  %v1217_v16 = vsel %vm1185_vm13, %v2950_v18, 128.0  ;;  %v1219_v40 = vsel %vm1187_vm14, %v2960_v36, 128.0  ;;  %v3208_v13 = vpop.permute.xlu0 %1575 }
 0x1fe   : > { %v1252_v38 = vmin.f32 %v1250_v33, %v1213_v58  ;;  %v1221_v32 = vsel %vm1189_vm15, %v2962_v1, 128.0  ;;  %v1239_v46 = vrot.slane %v1238_v39, 2  ;;  %v2237_v49 = vmov 1.0   ;;  %v3210_v22 = vpop.permute.xlu1 %1580 }
 0x1ff   : > { %v1253_v6 = vmin.f32 %v1251_v26, %v1215_v37 }
 0x200   : > { %v1254_v27 = vmin.f32 %v1252_v38, %v1217_v16  ;;  %v1240_v30 = vmin.f32 %v1238_v39, %v1239_v46 }
 0x201   : > { %v1255_v21 = vmin.f32 %v1253_v6, %v1219_v40  ;;  %v3212_v60 = vpop.permute.xlu0 %1585 }
 0x202   : > { %v1256_v57 = vmin.f32 %v1254_v27, %v1221_v32  ;;  %v1241_v8 = vrot.slane %v1240_v30, 1  ;;  %v3214_v48 = vpop.permute.xlu1 %1590 }
 0x204   : > { %v1257_v41 = vmin.f32 %v1255_v21, %v1256_v57  ;;  %v3043_v47 = vmin.f32 %v1240_v30, %v1241_v8 }
 0x206   : > { %v1258_v54 = vrot.slane %v1257_v41, 4  ;;  %vm1294_vm1 = vcmp.eq.f32.partialorder %v2962_v1, %v3043_v47  ;;  %vm1292_vm3 = vcmp.eq.f32.partialorder %v2960_v36, %v3043_v47  ;;  %vm1290_vm5 = vcmp.eq.f32.partialorder %v2950_v18, %v3043_v47  ;;  %v3218_v56 = vpop.permute.xlu1 %1600 }
 0x207   : > { %vm1288_vm7 = vcmp.eq.f32.partialorder %v2944_v17, %v3043_v47  ;;  %vm1286_vm9 = vcmp.eq.f32.partialorder %v2942_v15, %v3043_v47  ;;  %vm1284_vm11 = vcmp.eq.f32.partialorder %v2940_v4, %v3043_v47  ;;  %vm1282_vm13 = vcmp.eq.f32.partialorder %v2938_v29, %v3043_v47 }
 0x208   : > { %v1259_v34 = vmin.f32 %v1257_v41, %v1258_v54  ;;  %vm1280_vm15 = vcmp.eq.f32.partialorder %v2932_v61, %v3043_v47 }
 0x20a   : > { %v1260_v12 = vrot.slane %v1259_v34, 2  ;;  %v3222_v31 = vpop.permute.xlu1 %1610 }
 0x20c   : > { %v1261_v51 = vmin.f32 %v1259_v34, %v1260_v12 }
 0x20e   : > { %v1262_v7 = vrot.slane %v1261_v51, 1  ;;  %v3226_v63 = vpop.permute.xlu1 %1620 }
 0x210   : > { %v3045_v25 = vmin.f32 %v1261_v51, %v1262_v7 }
 0x212   : > { %vm1295_vm0 = vcmp.eq.f32.partialorder %v2962_v1, %v3045_v25  ;;  %vm1293_vm2 = vcmp.eq.f32.partialorder %v2960_v36, %v3045_v25  ;;  %vm1291_vm4 = vcmp.eq.f32.partialorder %v2950_v18, %v3045_v25  ;;  %vm1289_vm6 = vcmp.eq.f32.partialorder %v2944_v17, %v3045_v25  ;;  %v1372_v17 = vld [vmem:[%s3357_s6 + $0x60] sm:$0xff]  ;;  %v1373_v18 = vld [vmem:[%s3357_s6 + $0x68] sm:$0xff]  ;;  %v1374_v36 = vld [vmem:[%s3357_s6 + $0x70] sm:$0xff]  ;;  %v3231_v53 = vpop.permute.xlu1 %1630 }
 0x213   : > { %2056 = vmatprep.subr.msk.mxu1 %vm1295_vm0, %v2237_v49  ;;  %vm1287_vm8 = vcmp.eq.f32.partialorder %v2942_v15, %v3045_v25  ;;  %vm1285_vm10 = vcmp.eq.f32.partialorder %v2940_v4, %v3045_v25  ;;  %vm1283_vm12 = vcmp.eq.f32.partialorder %v2938_v29, %v3045_v25  ;;  %vm1281_vm14 = vcmp.eq.f32.partialorder %v2932_v61, %v3045_v25  ;;  %v1368_v61 = vld [vmem:[%s3357_s6 + $0x40] sm:$0xff]  ;;  %v1369_v29 = vld [vmem:[%s3357_s6 + $0x48] sm:$0xff]  ;;  %v1370_v4 = vld [vmem:[%s3357_s6 + $0x50] sm:$0xff] }
 0x214   : > { %2057 = vmatpush1.msk.msra.mxu1 %vm1294_vm1, %v2237_v49  ;;  %vm1279_vm0 = vcmp.eq.f32.partialorder %v2926_v0, %v3045_v25  ;;  %vm1278_vm1 = vcmp.eq.f32.partialorder %v2926_v0, %v3043_v47  ;;  %v1367_v0 = vld [vmem:[%s3357_s6 + $0x38] sm:$0xff] }
 0x215   : > { %2058 = vmatprep.subr.msk.mxu1 %vm1293_vm2, %v2237_v49  ;;  %vm1277_vm2 = vcmp.eq.f32.partialorder %v2924_v3, %v3045_v25  ;;  %v1371_v15 = vld [vmem:[%s3357_s6 + $0x58] sm:$0xff] }
 0x216   : > { %2059 = vmatpush1.msk.msra.mxu1 %vm1292_vm3, %v2237_v49  ;;  %vm1276_vm3 = vcmp.eq.f32.partialorder %v2924_v3, %v3043_v47  ;;  %v1366_v3 = vld [vmem:[%s3357_s6 + $0x30] sm:$0xff]  ;;  %v1375_v1 = vld [vmem:[%s3357_s6 + $0x78] sm:$0xff]  ;;  %v1689_v38 = vpop.permute.xlu1 %1688 }
 0x217   : > { %2060 = vmatprep.subr.msk.mxu1 %vm1291_vm4, %v2237_v49  ;;  %vm1275_vm4 = vcmp.eq.f32.partialorder %v2922_v55, %v3045_v25 }
 0x218   : > { %2061 = vmatpush1.msk.msra.mxu1 %vm1290_vm5, %v2237_v49  ;;  %vm1274_vm5 = vcmp.eq.f32.partialorder %v2922_v55, %v3043_v47  ;;  %v1365_v55 = vld [vmem:[%s3357_s6 + $0x28] sm:$0xff] }
 0x219   : > { %2062 = vmatprep.subr.msk.mxu1 %vm1289_vm6, %v2237_v49  ;;  %vm1273_vm6 = vcmp.eq.f32.partialorder %v2920_v52, %v3045_v25 }
 0x21a   : > { %2063 = vmatpush1.msk.msra.mxu1 %vm1288_vm7, %v2237_v49  ;;  %vm1272_vm7 = vcmp.eq.f32.partialorder %v2920_v52, %v3043_v47  ;;  %v1364_v52 = vld [vmem:[%s3357_s6 + $0x20] sm:$0xff] }
 0x21b   : > { %2064 = vmatprep.subr.msk.mxu1 %vm1287_vm8, %v2237_v49  ;;  %vm1271_vm8 = vcmp.eq.f32.partialorder %v2910_v28, %v3045_v25 }
 0x21c   : > { %2065 = vmatpush1.msk.msra.mxu1 %vm1286_vm9, %v2237_v49  ;;  %vm1270_vm9 = vcmp.eq.f32.partialorder %v2910_v28, %v3043_v47  ;;  %v1360_v28 = vld [vmem:[%s3357_s6] sm:$0xff] }
 0x21d   : > { %2066 = vmatprep.subr.msk.mxu1 %vm1285_vm10, %v2237_v49  ;;  %vm1269_vm10 = vcmp.eq.f32.partialorder %v2908_v11, %v3045_v25 }
 0x21e   : > { %2067 = vmatpush1.msk.msra.mxu1 %vm1284_vm11, %v2237_v49  ;;  %vm1268_vm11 = vcmp.eq.f32.partialorder %v2908_v11, %v3043_v47  ;;  %v1362_v11 = vld [vmem:[%s3357_s6 + $0x10] sm:$0xff] }
 0x21f   : > { %2068 = vmatprep.subr.msk.mxu1 %vm1283_vm12, %v2237_v49  ;;  %vm1267_vm12 = vcmp.eq.f32.partialorder %v2906_v9, %v3045_v25 }
 0x220   : > { %2069 = vmatpush1.msk.msra.mxu1 %vm1282_vm13, %v2237_v49  ;;  %vm1266_vm13 = vcmp.eq.f32.partialorder %v2906_v9, %v3043_v47  ;;  %v1361_v9 = vld [vmem:[%s3357_s6 + $0x8] sm:$0xff] }
 0x221   : > { %2070 = vmatprep.subr.msk.mxu1 %vm1281_vm14, %v2237_v49  ;;  %vm1265_vm14 = vcmp.eq.f32.partialorder %v2904_v44, %v3045_v25 }
 0x222   : > { %2071 = vmatpush1.msk.msra.mxu1 %vm1280_vm15, %v2237_v49  ;;  %vm1264_vm15 = vcmp.eq.f32.partialorder %v2904_v44, %v3043_v47  ;;  %v1363_v44 = vld [vmem:[%s3357_s6 + $0x18] sm:$0xff] }
 0x223   : > { %2072 = vmatprep.subr.msk.mxu1 %vm1279_vm0, %v2237_v49 }
 0x224   : > { %2073 = vmatpush1.msk.msra.mxu1 %vm1278_vm1, %v2237_v49 }
 0x225   : > { %2074 = vmatprep.subr.msk.mxu1 %vm1277_vm2, %v2237_v49 }
 0x226   : > { %2075 = vmatpush1.msk.msra.mxu1 %vm1276_vm3, %v2237_v49 }
 0x227   : > { %2076 = vmatprep.subr.msk.mxu1 %vm1275_vm4, %v2237_v49 }
 0x228   : > { %2077 = vmatpush1.msk.msra.mxu1 %vm1274_vm5, %v2237_v49 }
 0x229   : > { %2078 = vmatprep.subr.msk.mxu1 %vm1273_vm6, %v2237_v49 }
 0x22a   : > { %2079 = vmatpush1.msk.msra.mxu1 %vm1272_vm7, %v2237_v49 }
 0x22b   : > { %2080 = vmatprep.subr.msk.mxu1 %vm1271_vm8, %v2237_v49 }
 0x22c   : > { %2081 = vmatpush1.msk.msra.mxu1 %vm1270_vm9, %v2237_v49 }
 0x22d   : > { %2082 = vmatprep.subr.msk.mxu1 %vm1269_vm10, %v2237_v49 }
 0x22e   : > { %2083 = vmatpush1.msk.msra.mxu1 %vm1268_vm11, %v2237_v49 }
 0x22f   : > { %2084 = vmatprep.subr.msk.mxu1 %vm1267_vm12, %v2237_v49 }
 0x230   : > { %2085 = vmatpush1.msk.msra.mxu1 %vm1266_vm13, %v2237_v49 }
 0x231   : > { %2086 = vmatprep.subr.msk.mxu1 %vm1265_vm14, %v2237_v49 }
 0x232   : > { %2087 = vmatpush1.msk.msra.mxu1 %vm1264_vm15, %v2237_v49  ;;  %v1699_v49 = vpop.permute.xlu1 %1698 }
 0x233   : > { %1441 = vmatmul.mubr.f32.vlgmr.msra.gmra.mxu1 %v1360_v28 }
 0x234   : > { %1446 = vmatprep.mubr.f32.mxu1 %v2236_v35 }
 0x237   : > { %1447 = vmatmul.mubr.f32.gmra.mxu1 %v1361_v9 }
 0x238   : > { %1452 = vmatprep.mubr.f32.mxu1 %v2236_v35 }
 0x23b   : > { %1453 = vmatmul.mubr.f32.gmra.mxu1 %v1362_v11 }
 0x23c   : > { %1458 = vmatprep.mubr.f32.mxu1 %v2236_v35 }
 0x23f   : > { %1459 = vmatmul.mubr.f32.gmra.mxu1 %v1363_v44 }
 0x240   : > { %1464 = vmatprep.mubr.f32.mxu1 %v2236_v35 }
 0x243   : > { %1465 = vmatmul.mubr.f32.gmra.mxu1 %v1364_v52 }
 0x244   : > { %1470 = vmatprep.mubr.f32.mxu1 %v2236_v35 }
 0x247   : > { %1471 = vmatmul.mubr.f32.gmra.mxu1 %v1365_v55 }
 0x248   : > { %1476 = vmatprep.mubr.f32.mxu1 %v2236_v35 }
 0x24b   : > { %1477 = vmatmul.mubr.f32.gmra.mxu1 %v1366_v3 }
 0x24c   : > { %1482 = vmatprep.mubr.f32.mxu1 %v2236_v35 }
 0x24f   : > { %1483 = vmatmul.mubr.f32.gmra.mxu1 %v1367_v0 }
 0x250   : > { %1488 = vmatprep.mubr.f32.mxu1 %v2236_v35 }
 0x253   : > { %1489 = vmatmul.mubr.f32.gmra.mxu1 %v1368_v61 }
 0x254   : > { %1494 = vmatprep.mubr.f32.mxu1 %v2236_v35 }
 0x257   : > { %1495 = vmatmul.mubr.f32.gmra.mxu1 %v1369_v29 }
 0x258   : > { %1500 = vmatprep.mubr.f32.mxu1 %v2236_v35 }
 0x25b   : > { %1501 = vmatmul.mubr.f32.gmra.mxu1 %v1370_v4 }
 0x25c   : > { %1506 = vmatprep.mubr.f32.mxu1 %v2236_v35 }
 0x25f   : > { %1507 = vmatmul.mubr.f32.gmra.mxu1 %v1371_v15 }
 0x260   : > { %1512 = vmatprep.mubr.f32.mxu1 %v2236_v35 }
 0x263   : > { %1513 = vmatmul.mubr.f32.gmra.mxu1 %v1372_v17 }
 0x264   : > { %1518 = vmatprep.mubr.f32.mxu1 %v2236_v35 }
 0x267   : > { %1519 = vmatmul.mubr.f32.gmra.mxu1 %v1373_v18 }
 0x268   : > { %1524 = vmatprep.mubr.f32.mxu1 %v2236_v35 }
 0x26b   : > { %1525 = vmatmul.mubr.f32.gmra.mxu1 %v1374_v36 }
 0x26c   : > { %1530 = vmatprep.mubr.f32.mxu1 %v2236_v35  ;;  %v3216_v35 = vpop.permute.xlu0 %1595 }
 0x26f   : > { %1531 = vmatmul.mubr.f32.gmra.mxu1 %v1375_v1 }
 0x270   : > { %v3220_v24 = vpop.permute.xlu0 %1605 }
 0x274   : > { %v3224_v2 = vpop.permute.xlu0 %1615 }
 0x278   : > { %v3228_v23 = vpop.permute.xlu0 %1625 }
 0x27c   : > { %v1684_v20 = vpop.permute.xlu0 %1683 }
 0x280   : > { %v1694_v46 = vpop.permute.xlu0 %1693 }
 0x284   : > { %v1704_v4 = vpop.permute.xlu0 %1703 }
 0x2f3   : > { %v1442_v14 = vpop.f32.mrf.mxu1 }
 0x2f4   : > { %v1633_v10 = vmul.f32 %v1556_v43, %v1442_v14 }
 0x2f5   : > { %v1444_v50 = vpop.f32.mrf.mxu1 }
 0x2f6   : > { %v1761_v45 = vadd.f32 %v1684_v20, %v1633_v10  ;;  %v1634_v19 = vmul.f32 %v1556_v43, %v1444_v50  ;;  %v1709_v10 = vpop.permute.xlu1 %1708 }
 0x2f7   : > { %v1448_v33 = vpop.f32.mrf.mxu1 }
 0x2f8   : > { %vm1793_vm0 = vcmp.ge.f32.partialorder %v1761_v45, 0.0  ;;  %v1825_v62 = vmul.f32 0.2, %v1761_v45  ;;  %v1762_v58 = vadd.f32 %v1684_v20, %v1634_v19  ;;  %v1635_v26 = vmul.f32 %v1561_v42, %v1448_v33 }
 0x2f9   : > { %v1450_v39 = vpop.f32.mrf.mxu1 }
 0x2fa   : > { %v1857_v37 = vsel %vm1793_vm0, %v1761_v45, %v1825_v62  ;;  %vm1794_vm1 = vcmp.ge.f32.partialorder %v1762_v58, 0.0  ;;  %v1826_v16 = vmul.f32 0.2, %v1762_v58  ;;  %v1763_v6 = vadd.f32 %v1689_v38, %v1635_v26 }
 0x2fb   : > { %1889 = vst [vmem:[%s3235_s25] sm:$0xff] %v1857_v37  ;;  %v1636_v27 = vmul.f32 %v1561_v42, %v1450_v39  ;;  %v1454_v40 = vpop.f32.mrf.mxu1  ;;  %v1714_v39 = vpop.permute.xlu0 %1713 }
 0x2fc   : > { %v1858_v32 = vsel %vm1794_vm1, %v1762_v58, %v1826_v16  ;;  %vm1795_vm2 = vcmp.ge.f32.partialorder %v1763_v6, 0.0  ;;  %v1827_v21 = vmul.f32 0.2, %v1763_v6  ;;  %v1637_v57 = vmul.f32 %v1566_v5, %v1454_v40 }
 0x2fd   : > { %1890 = vst [vmem:[%s3235_s25 + $0x8] sm:$0xff] %v1858_v32  ;;  %v1764_v41 = vadd.f32 %v1689_v38, %v1636_v27  ;;  %v1456_v54 = vpop.f32.mrf.mxu1 }
 0x2fe   : > { %v1859_v30 = vsel %vm1795_vm2, %v1763_v6, %v1827_v21  ;;  %v1765_v34 = vadd.f32 %v1694_v46, %v1637_v57  ;;  %v1638_v12 = vmul.f32 %v1566_v5, %v1456_v54 }
 0x2ff   : > { %1891 = vst [vmem:[%s3235_s25 + $0x10] sm:$0xff] %v1859_v30  ;;  %vm1796_vm3 = vcmp.ge.f32.partialorder %v1764_v41, 0.0  ;;  %v1828_v8 = vmul.f32 0.2, %v1764_v41  ;;  %v1460_v51 = vpop.f32.mrf.mxu1 }
 0x300   : > { %vm1797_vm4 = vcmp.ge.f32.partialorder %v1765_v34, 0.0  ;;  %v1829_v7 = vmul.f32 0.2, %v1765_v34  ;;  %v1766_v47 = vadd.f32 %v1694_v46, %v1638_v12  ;;  %v1639_v25 = vmul.f32 %v3206_v59, %v1460_v51 }
 0x301   : > { %v1860_v28 = vsel %vm1796_vm3, %v1764_v41, %v1828_v8  ;;  %v1462_v9 = vpop.f32.mrf.mxu1  ;;  %v1719_v41 = vpop.permute.xlu1 %1718 }
 0x302   : > { %1892 = vst [vmem:[%s3235_s25 + $0x18] sm:$0xff] %v1860_v28  ;;  %v1861_v11 = vsel %vm1797_vm4, %v1765_v34, %v1829_v7  ;;  %vm1798_vm5 = vcmp.ge.f32.partialorder %v1766_v47, 0.0  ;;  %v1830_v44 = vmul.f32 0.2, %v1766_v47  ;;  %v1767_v52 = vadd.f32 %v1699_v49, %v1639_v25 }
 0x303   : > { %1893 = vst [vmem:[%s3235_s25 + $0x20] sm:$0xff] %v1861_v11  ;;  %v1640_v55 = vmul.f32 %v3206_v59, %v1462_v9  ;;  %v1466_v3 = vpop.f32.mrf.mxu1 }
 0x304   : > { %v1862_v0 = vsel %vm1798_vm5, %v1766_v47, %v1830_v44  ;;  %vm1799_vm6 = vcmp.ge.f32.partialorder %v1767_v52, 0.0  ;;  %v1831_v61 = vmul.f32 0.2, %v1767_v52  ;;  %v1641_v29 = vmul.f32 %v3208_v13, %v1466_v3 }
 0x305   : > { %1894 = vst [vmem:[%s3235_s25 + $0x28] sm:$0xff] %v1862_v0  ;;  %v1768_v15 = vadd.f32 %v1699_v49, %v1640_v55  ;;  %v1468_v17 = vpop.f32.mrf.mxu1  ;;  %v1724_v49 = vpop.permute.xlu0 %1723 }
 0x306   : > { %v1863_v18 = vsel %vm1799_vm6, %v1767_v52, %v1831_v61  ;;  %v1769_v36 = vadd.f32 %v1704_v4, %v1641_v29  ;;  %v1642_v1 = vmul.f32 %v3208_v13, %v1468_v17  ;;  %v1729_v29 = vpop.permute.xlu1 %1728 }
 0x307   : > { %1895 = vst [vmem:[%s3235_s25 + $0x30] sm:$0xff] %v1863_v18  ;;  %vm1800_vm7 = vcmp.ge.f32.partialorder %v1768_v15, 0.0  ;;  %v1832_v43 = vmul.f32 0.2, %v1768_v15  ;;  %v1472_v42 = vpop.f32.mrf.mxu1 }
 0x308   : > { %vm1801_vm8 = vcmp.ge.f32.partialorder %v1769_v36, 0.0  ;;  %v1833_v5 = vmul.f32 0.2, %v1769_v36  ;;  %v1770_v59 = vadd.f32 %v1704_v4, %v1642_v1  ;;  %v1643_v14 = vmul.f32 %v3210_v22, %v1472_v42 }
 0x309   : > { %v1864_v20 = vsel %vm1800_vm7, %v1768_v15, %v1832_v43  ;;  %v1474_v50 = vpop.f32.mrf.mxu1 }
 0x30a   : > { %1896 = vst [vmem:[%s3235_s25 + $0x38] sm:$0xff] %v1864_v20  ;;  %v1865_v45 = vsel %vm1801_vm8, %v1769_v36, %v1833_v5  ;;  %vm1802_vm9 = vcmp.ge.f32.partialorder %v1770_v59, 0.0  ;;  %v1834_v19 = vmul.f32 0.2, %v1770_v59  ;;  %v1771_v13 = vadd.f32 %v1709_v10, %v1643_v14 }
 0x30b   : > { %1897 = vst [vmem:[%s3235_s25 + $0x40] sm:$0xff] %v1865_v45  ;;  %v1644_v33 = vmul.f32 %v3210_v22, %v1474_v50  ;;  %v1478_v62 = vpop.f32.mrf.mxu1 }
 0x30c   : > { %v1866_v58 = vsel %vm1802_vm9, %v1770_v59, %v1834_v19  ;;  %vm1803_vm10 = vcmp.ge.f32.partialorder %v1771_v13, 0.0  ;;  %v1835_v26 = vmul.f32 0.2, %v1771_v13  ;;  %v1645_v38 = vmul.f32 %v3212_v60, %v1478_v62  ;;  %v1734_v59 = vpop.permute.xlu0 %1733 }
 0x30d   : > { %1898 = vst [vmem:[%s3235_s25 + $0x48] sm:$0xff] %v1866_v58  ;;  %v1772_v37 = vadd.f32 %v1709_v10, %v1644_v33  ;;  %v1480_v16 = vpop.f32.mrf.mxu1  ;;  %v1739_v58 = vpop.permute.xlu1 %1738 }
 0x30e   : > { %v1867_v6 = vsel %vm1803_vm10, %v1771_v13, %v1835_v26  ;;  %v1773_v27 = vadd.f32 %v1714_v39, %v1645_v38  ;;  %v1646_v40 = vmul.f32 %v3212_v60, %v1480_v16 }
 0x30f   : > { %1899 = vst [vmem:[%s3235_s25 + $0x50] sm:$0xff] %v1867_v6  ;;  %vm1804_vm11 = vcmp.ge.f32.partialorder %v1772_v37, 0.0  ;;  %v1836_v32 = vmul.f32 0.2, %v1772_v37  ;;  %v1484_v22 = vpop.f32.mrf.mxu1 }
 0x310   : > { %vm1805_vm12 = vcmp.ge.f32.partialorder %v1773_v27, 0.0  ;;  %v1837_v21 = vmul.f32 0.2, %v1773_v27  ;;  %v1774_v57 = vadd.f32 %v1714_v39, %v1646_v40  ;;  %v1647_v46 = vmul.f32 %v3214_v48, %v1484_v22  ;;  %v1744_v22 = vpop.permute.xlu0 %1743 }
 0x311   : > { %v1868_v54 = vsel %vm1804_vm11, %v1772_v37, %v1836_v32  ;;  %v1486_v30 = vpop.f32.mrf.mxu1 }
 0x312   : > { %1900 = vst [vmem:[%s3235_s25 + $0x58] sm:$0xff] %v1868_v54  ;;  %v1869_v34 = vsel %vm1805_vm12, %v1773_v27, %v1837_v21  ;;  %vm1806_vm13 = vcmp.ge.f32.partialorder %v1774_v57, 0.0  ;;  %v1838_v12 = vmul.f32 0.2, %v1774_v57  ;;  %v1775_v60 = vadd.f32 %v1719_v41, %v1647_v46 }
 0x313   : > { %1901 = vst [vmem:[%s3235_s25 + $0x60] sm:$0xff] %v1869_v34  ;;  %v1648_v8 = vmul.f32 %v3214_v48, %v1486_v30  ;;  %v1490_v51 = vpop.f32.mrf.mxu1 }
 0x314   : > { %v1870_v7 = vsel %vm1806_vm13, %v1774_v57, %v1838_v12  ;;  %vm1807_vm14 = vcmp.ge.f32.partialorder %v1775_v60, 0.0  ;;  %v1839_v47 = vmul.f32 0.2, %v1775_v60  ;;  %v1649_v25 = vmul.f32 %v3216_v35, %v1490_v51 }
 0x315   : > { %1902 = vst [vmem:[%s3235_s25 + $0x68] sm:$0xff] %v1870_v7  ;;  %v1776_v28 = vadd.f32 %v1719_v41, %v1648_v8  ;;  %v1492_v9 = vpop.f32.mrf.mxu1  ;;  %v1749_v8 = vpop.permute.xlu1 %1748 }
 0x316   : > { %v1871_v11 = vsel %vm1807_vm14, %v1775_v60, %v1839_v47  ;;  %v1777_v44 = vadd.f32 %v1724_v49, %v1649_v25  ;;  %v1650_v52 = vmul.f32 %v3216_v35, %v1492_v9 }
 0x317   : > { %1903 = vst [vmem:[%s3235_s25 + $0x70] sm:$0xff] %v1871_v11  ;;  %vm1808_vm15 = vcmp.ge.f32.partialorder %v1776_v28, 0.0  ;;  %v1840_v55 = vmul.f32 0.2, %v1776_v28  ;;  %v1496_v48 = vpop.f32.mrf.mxu1 }
 0x318   : > { %vm1809_vm0 = vcmp.ge.f32.partialorder %v1777_v44, 0.0  ;;  %v1841_v3 = vmul.f32 0.2, %v1777_v44  ;;  %v1778_v0 = vadd.f32 %v1724_v49, %v1650_v52  ;;  %v1651_v61 = vmul.f32 %v3218_v56, %v1496_v48  ;;  %v1754_v52 = vpop.permute.xlu0 %1753 }
 0x319   : > { %v1872_v4 = vsel %vm1808_vm15, %v1776_v28, %v1840_v55  ;;  %v1498_v15 = vpop.f32.mrf.mxu1 }
 0x31a   : > { %1904 = vst [vmem:[%s3235_s25 + $0x78] sm:$0xff] %v1872_v4  ;;  %v1873_v17 = vsel %vm1809_vm0, %v1777_v44, %v1841_v3  ;;  %vm1810_vm1 = vcmp.ge.f32.partialorder %v1778_v0, 0.0  ;;  %v1842_v18 = vmul.f32 0.2, %v1778_v0  ;;  %v1779_v35 = vadd.f32 %v1729_v29, %v1651_v61 }
 0x31b   : > { %1905 = vst [vmem:[%s3235_s25 + $0x80] sm:$0xff] %v1873_v17  ;;  %v1652_v36 = vmul.f32 %v3218_v56, %v1498_v15  ;;  %v1502_v1 = vpop.f32.mrf.mxu1 }
 0x31c   : > { %v1874_v43 = vsel %vm1810_vm1, %v1778_v0, %v1842_v18  ;;  %vm1811_vm2 = vcmp.ge.f32.partialorder %v1779_v35, 0.0  ;;  %v1843_v42 = vmul.f32 0.2, %v1779_v35  ;;  %v1653_v5 = vmul.f32 %v3220_v24, %v1502_v1  ;;  %v1759_v18 = vpop.permute.xlu1 %1758 }
 0x31d   : > { %1906 = vst [vmem:[%s3235_s25 + $0x88] sm:$0xff] %v1874_v43  ;;  %v1780_v14 = vadd.f32 %v1729_v29, %v1652_v36  ;;  %v1504_v10 = vpop.f32.mrf.mxu1 }
 0x31e   : > { %v1875_v20 = vsel %vm1811_vm2, %v1779_v35, %v1843_v42  ;;  %v1781_v50 = vadd.f32 %v1734_v59, %v1653_v5  ;;  %v1654_v45 = vmul.f32 %v3220_v24, %v1504_v10 }
 0x31f   : > { %1907 = vst [vmem:[%s3235_s25 + $0x90] sm:$0xff] %v1875_v20  ;;  %vm1812_vm3 = vcmp.ge.f32.partialorder %v1780_v14, 0.0  ;;  %v1844_v19 = vmul.f32 0.2, %v1780_v14  ;;  %v1508_v56 = vpop.f32.mrf.mxu1 }
 0x320   : > { %vm1813_vm4 = vcmp.ge.f32.partialorder %v1781_v50, 0.0  ;;  %v1845_v13 = vmul.f32 0.2, %v1781_v50  ;;  %v1782_v33 = vadd.f32 %v1734_v59, %v1654_v45  ;;  %v1655_v62 = vmul.f32 %v3222_v31, %v1508_v56 }
 0x321   : > { %v1876_v26 = vsel %vm1812_vm3, %v1780_v14, %v1844_v19  ;;  %v1510_v38 = vpop.f32.mrf.mxu1 }
 0x322   : > { %1908 = vst [vmem:[%s3235_s25 + $0x98] sm:$0xff] %v1876_v26  ;;  %v1877_v39 = vsel %vm1813_vm4, %v1781_v50, %v1845_v13  ;;  %vm1814_vm5 = vcmp.ge.f32.partialorder %v1782_v33, 0.0  ;;  %v1846_v37 = vmul.f32 0.2, %v1782_v33  ;;  %v1783_v24 = vadd.f32 %v1739_v58, %v1655_v62 }
 0x323   : > { %1909 = vst [vmem:[%s3235_s25 + $0xa0] sm:$0xff] %v1877_v39  ;;  %v1656_v16 = vmul.f32 %v3222_v31, %v1510_v38  ;;  %v1514_v6 = vpop.f32.mrf.mxu1 }
 0x324   : > { %v1878_v27 = vsel %vm1814_vm5, %v1782_v33, %v1846_v37  ;;  %vm1815_vm6 = vcmp.ge.f32.partialorder %v1783_v24, 0.0  ;;  %v1847_v40 = vmul.f32 0.2, %v1783_v24  ;;  %v1657_v32 = vmul.f32 %v3224_v2, %v1514_v6 }
 0x325   : > { %1910 = vst [vmem:[%s3235_s25 + $0xa8] sm:$0xff] %v1878_v27  ;;  %v1784_v21 = vadd.f32 %v1739_v58, %v1656_v16  ;;  %v1516_v57 = vpop.f32.mrf.mxu1 }
 0x326   : > { %v1879_v46 = vsel %vm1815_vm6, %v1783_v24, %v1847_v40  ;;  %v1785_v41 = vadd.f32 %v1744_v22, %v1657_v32  ;;  %v1658_v54 = vmul.f32 %v3224_v2, %v1516_v57 }
 0x327   : > { %1911 = vst [vmem:[%s3235_s25 + $0xb0] sm:$0xff] %v1879_v46  ;;  %vm1816_vm7 = vcmp.ge.f32.partialorder %v1784_v21, 0.0  ;;  %v1848_v30 = vmul.f32 0.2, %v1784_v21  ;;  %v1520_v31 = vpop.f32.mrf.mxu1 }
 0x328   : > { %vm1817_vm8 = vcmp.ge.f32.partialorder %v1785_v41, 0.0  ;;  %v1849_v34 = vmul.f32 0.2, %v1785_v41  ;;  %v1786_v12 = vadd.f32 %v1744_v22, %v1658_v54  ;;  %v1659_v60 = vmul.f32 %v3226_v63, %v1520_v31 }
 0x329   : > { %v1880_v51 = vsel %vm1816_vm7, %v1784_v21, %v1848_v30  ;;  %v1522_v7 = vpop.f32.mrf.mxu1 }
 0x32a   : > { %1912 = vst [vmem:[%s3235_s25 + $0xb8] sm:$0xff] %v1880_v51  ;;  %v1881_v47 = vsel %vm1817_vm8, %v1785_v41, %v1849_v34  ;;  %vm1818_vm9 = vcmp.ge.f32.partialorder %v1786_v12, 0.0  ;;  %v1850_v25 = vmul.f32 0.2, %v1786_v12  ;;  %v1787_v2 = vadd.f32 %v1749_v8, %v1659_v60 }
 0x32b   : > { %1913 = vst [vmem:[%s3235_s25 + $0xc0] sm:$0xff] %v1881_v47  ;;  %v1660_v49 = vmul.f32 %v3226_v63, %v1522_v7  ;;  %v1526_v28 = vpop.f32.mrf.mxu1 }
 0x32c   : > { %v1882_v9 = vsel %vm1818_vm9, %v1786_v12, %v1850_v25  ;;  %vm1819_vm10 = vcmp.ge.f32.partialorder %v1787_v2, 0.0  ;;  %v1851_v11 = vmul.f32 0.2, %v1787_v2  ;;  %v1661_v44 = vmul.f32 %v3228_v23, %v1526_v28 }
 0x32d   : > { %1914 = vst [vmem:[%s3235_s25 + $0xc8] sm:$0xff] %v1882_v9  ;;  %v1788_v55 = vadd.f32 %v1749_v8, %v1660_v49  ;;  %v1528_v48 = vpop.f32.mrf.mxu1 }
 0x32e   : > { %v1883_v3 = vsel %vm1819_vm10, %v1787_v2, %v1851_v11  ;;  %v1789_v0 = vadd.f32 %v1754_v52, %v1661_v44  ;;  %v1662_v61 = vmul.f32 %v3228_v23, %v1528_v48 }
 0x32f   : > { %1915 = vst [vmem:[%s3235_s25 + $0xd0] sm:$0xff] %v1883_v3  ;;  %vm1820_vm11 = vcmp.ge.f32.partialorder %v1788_v55, 0.0  ;;  %v1852_v29 = vmul.f32 0.2, %v1788_v55  ;;  %v1532_v63 = vpop.f32.mrf.mxu1 }
 0x330   : > { %vm1821_vm12 = vcmp.ge.f32.partialorder %v1789_v0, 0.0  ;;  %v1853_v4 = vmul.f32 0.2, %v1789_v0  ;;  %v1790_v15 = vadd.f32 %v1754_v52, %v1662_v61  ;;  %v1663_v17 = vmul.f32 %v3231_v53, %v1532_v63 }
 0x331   : > { %v1884_v35 = vsel %vm1820_vm11, %v1788_v55, %v1852_v29  ;;  %v1534_v36 = vpop.f32.mrf.mxu1 }
 0x332   : > { %1916 = vst [vmem:[%s3235_s25 + $0xd8] sm:$0xff] %v1884_v35  ;;  %v1885_v1 = vsel %vm1821_vm12, %v1789_v0, %v1853_v4  ;;  %vm1822_vm13 = vcmp.ge.f32.partialorder %v1790_v15, 0.0  ;;  %v1854_v23 = vmul.f32 0.2, %v1790_v15  ;;  %v1791_v43 = vadd.f32 %v1759_v18, %v1663_v17 }
 0x333   : > { %1917 = vst [vmem:[%s3235_s25 + $0xe0] sm:$0xff] %v1885_v1  ;;  %v1664_v42 = vmul.f32 %v3231_v53, %v1534_v36 }
 0x334   : > { %v1886_v5 = vsel %vm1822_vm13, %v1790_v15, %v1854_v23  ;;  %vm1823_vm14 = vcmp.ge.f32.partialorder %v1791_v43, 0.0  ;;  %v1855_v59 = vmul.f32 0.2, %v1791_v43 }
 0x335   : > { %1918 = vst [vmem:[%s3235_s25 + $0xe8] sm:$0xff] %v1886_v5  ;;  %v1792_v14 = vadd.f32 %v1759_v18, %v1664_v42 }
 0x336   : > { %v1887_v10 = vsel %vm1823_vm14, %v1791_v43, %v1855_v59 }
 0x337   : > { %1919 = vst [vmem:[%s3235_s25 + $0xf0] sm:$0xff] %v1887_v10  ;;  %vm1824_vm15 = vcmp.ge.f32.partialorder %v1792_v14, 0.0  ;;  %v1856_v20 = vmul.f32 0.2, %v1792_v14 }
 0x339   : > { %v1888_v53 = vsel %vm1824_vm15, %v1792_v14, %v1856_v20 }
 0x33a   : > { %1920 = vst [vmem:[%s3235_s25 + $0xf8] sm:$0xff] %v1888_v53 }
 0x33b   : > { %2170 = shalt.err (!%p2167_p5)
}
 0x33c   : > { %s2171_s23 = scalar_lea.hbm %s3299_s29, 4096  ;;  %s2175_s26 = scalar_lea.hbm %s3360_s9, 8192 }
 0x33d   : > { %p2172_p6 = scmp.ne.s32.totalorder %s3299_s29, %s2171_s23  ;;  %p2176_p10 = scmp.lt.s32.totalorder %s3299_s29, %s3360_s9 }
 0x33e   : > { %p2177_p11 = scmp.lt.s32.totalorder %s2175_s26, %s2171_s23 }
 0x33f   : > { %p2173_p7 = pnand %p2172_p6, %p2331_p4 }
 0x340   : > { %p2178_p12 = por %p2177_p11, %p2176_p10 }
 0x341   : > { %p2174_p9 = pneg %p2173_p7 }
 0x343   : > { %p2179_p13 = pnand %p2178_p12, %p2174_p9 }
 0x345   : > { %2182 = shalt.err (!%p2179_p13)
}
 0x346   : > { %s2239_s16 = smov 256   ;;  %s2240_s18 = smov 16  }
 0x347   : > { %2095 = dma.vmem_to_hbm [thread:$0]  (%p2331_p4), %s3301_s27, 4096, %s3299_s29, %s3306_s12, %s2239_s16, %s2239_s16, %s2240_s18  }
 0x348 PF: > { %p2101_p0 = scmp.ge.s32.totalorder %s2233_s14, 2  ;;  %s1952_s20 = sand.u32 1, %s2213_s30  }
 0x349   : > { %s1953_s1 = scalar_lea.sflag [#allocation3], %s1952_s20 }
 0x34a   : > { %p2098_p1 = pnand %p2101_p0, %p2338_p8 }
 0x34c   : > { %p2099_p2 = pneg %p2098_p1 }
 0x34e   : > { %2208 = dma.done.wait (%p2099_p2), %s1953_s1, 4096  }
 0x34f   : > { %2210 = vsyncadd (%p2099_p2), %s1953_s1, 4294963200  ;;  %s22_s14 = sadd.s32 1, %s2233_s14   ;;  %s3365_s30 = smov %s2217_s10 }
 0x350   : > { %p19_p3 = scmp.ge.s32.totalorder %s22_s14, 4   ;;  %s3366_s10 = smov %s2221_s11 }
 0x351   : > { %s3367_s11 = smov %s2344_s22  ;;  %s3368_s12 = smov %s2229_s13 }
 0x352   : > { %s3369_s13 = smov %s3371_s17  ;;  %21 = sbr.rel (!%p19_p3) target bundleno = 6 (0x6), region = 91 }
 0x357   :  { %1958 = vsyncpa [#allocation3], 1 }
 0x358   :  { %1960 = vsyncpa [#allocation3 + $0x1], 1 }

</bundles_post_ra>
